<compile_context>
chip_gen: v5e
topology: v5e:2x2
jax: 0.10.0
libtpu: 0.0.40
codegen_flags: <defaults>
</compile_context>

<pallas_src>
import jax
import jax.numpy as jnp
import numpy as np
from jax import lax
from jax.experimental import pallas as pl
from jax.experimental.pallas import tpu as pltpu


# Architecture constants implied by fc1's 256 inputs: 14x14x2 input ->
# conv1(3x3) 12x12x32 -> pool 6x6x32 -> conv2(3x3) 4x4x64 -> pool 2x2x64 -> 256.
_K = 3              # conv kernel size
_H1 = _W1 = 6       # pooled conv1 map (36 rows per image)
_LANES = 128        # every channel-like axis is zero-padded to 128 lanes
_BT = 2             # batch elements per grid step (small -> low vreg pressure)
_BS = 8             # sublane-aligned row stride for pooled / fc blocks


def _round_up(x, m):
    return (x + m - 1) // m * m


# ------------------------------ Pallas kernel --------------------------------

def _fused_forward_kernel(p1_ref, sel_ref, w1_ref, b1_ref, w2_ref, b2_ref,
                          w3_ref, b3_ref, w4_ref, b4_ref, o_ref,
                          a1_ref, patch_ref, z_ref):
    """Whole BaselineNet forward for one batch tile; everything stays in VMEM.

    p1_ref   : (4*nt, 18) bf16  conv1 im2col patches, 4 pool quadrants stacked on M
    sel_ref  : (4*_BS, nt-8) bf16  0/1 gather of the 4 valid pooled conv2 rows
    w1_ref   : (18, 128)  bf16  conv1 weight, (kh,kw,ci) x padded Cout
    w2_ref   : (288, 128) bf16  conv2 weight, (kh,kw,ci) x padded Cout
    w3_ref   : (512, 128) bf16  fc1 weight, (pool pos p, padded ci) x padded hidden
    w4_ref   : (128, 128) bf16  fc2 weight, padded hidden x padded out
    b*_ref   : (1, 128)   f32   zero-padded biases
    o_ref    : (_BT, 128) f32   fc2 output (lanes >= 2 are padding)
    a1_ref   : (nt+16, 32) bf16 scratch: pooled conv1 activations (+14-row tap slack)
    patch_ref: (nt, 288)  bf16  scratch: conv2 im2col patches
    z_ref    : (nt, 128)  f32   scratch: conv2 pre-pool output on the 6x6 grid
    """
    f32, bf16 = jnp.float32, jnp.bfloat16
    bt = o_ref.shape[0]
    nt = _H1 * _W1 * bt            # 36*bt rows: full 6x6 conv1-pooled grid per image
    nq = nt - _BS                  # rows over which the 2x2-pool window max is formed

    # ---- conv1 + 2x2 max-pool + ReLU (two quadrant-pair matmuls, incremental max)
    w1 = w1_ref[...]
    ya = jnp.dot(p1_ref[0:2 * nt, :], w1, preferred_element_type=f32)
    y = jnp.maximum(ya[0:nt], ya[nt:2 * nt])
    yb = jnp.dot(p1_ref[2 * nt:4 * nt, :], w1, preferred_element_type=f32)
    y = jnp.maximum(y, jnp.maximum(yb[0:nt], yb[nt:2 * nt]))
    y = jnp.maximum(y + b1_ref[...], 0.0)
    a1_ref[0:nt, :] = y[:, :32].astype(bf16)          # 32 real channels, bf16 once
    # Tail rows only feed conv2 rows the pool/selector never reads; zero them so
    # no stale-VMEM NaN/Inf can reach the selector's 0*x products.
    a1_ref[nt:, :] = jnp.zeros((a1_ref.shape[0] - nt, 32), bf16)

    # ---- conv2: build (nt, 288) im2col patches with 9 shifted copies, ONE matmul
    for kh in range(_K):
        for kw in range(_K):
            t = kh * _K + kw
            patch_ref[:, t * 32:(t + 1) * 32] = a1_ref[pl.ds(kh * _W1 + kw, nt), :]
    z_ref[...] = jnp.dot(patch_ref[...], w2_ref[...], preferred_element_type=f32)

    # ---- conv2 2x2 max-pool (+bias +ReLU): window rows r, r+1, r+6, r+7 on the
    #      6x6 grid; only anchors (b, 2ph, 2pw) are valid and only those are
    #      gathered by the selector below, so garbage rows never propagate.
    zq = jnp.maximum(
        jnp.maximum(z_ref[pl.ds(0, nq), :], z_ref[pl.ds(1, nq), :]),
        jnp.maximum(z_ref[pl.ds(_W1, nq), :], z_ref[pl.ds(_W1 + 1, nq), :]))
    zr = jnp.maximum(zq + b2_ref[...], 0.0).astype(bf16)

    # ---- gather the 4 valid pooled rows per image (tiny 0/1 bf16 selector matmul)
    pooled = jnp.dot(sel_ref[...], zr, preferred_element_type=f32).astype(bf16)

    # ---- fc1 + ReLU: contract the 4 pooled positions (K=128 each, aligned slices)
    h = jnp.dot(pooled[0:_BS], w3_ref[0:_LANES, :], preferred_element_type=f32)
    for p in range(1, 4):
        h = h + jnp.dot(pooled[p * _BS:(p + 1) * _BS],
                        w3_ref[p * _LANES:(p + 1) * _LANES, :],
                        preferred_element_type=f32)
    h = jnp.maximum(h + b3_ref[...], 0.0)

    # ---- fc2 (lane-dense store; wrapper slices the 2 real outputs)
    o = jnp.dot(h.astype(bf16), w4_ref[...], preferred_element_type=f32) + b4_ref[...]
    o_ref[...] = o[0:bt]


# ------------------------------- wrapper glue ---------------------------------

def _conv1_pool_patches(x_nhwc):
    """conv1 im2col patches, grouped per batch tile, 4 pool quadrants stacked on M.

    Row order: (tile, quadrant, image-in-tile, pooled_h, pooled_w); within a
    quadrant rows match a1's (b, h, w) 6x6 grid indexing used by the kernel.
    """
    B, H, W, C = x_nhwc.shape
    Ho, Wo = H - _K + 1, W - _K + 1            # 12, 12
    Hp, Wp = Ho // 2, Wo // 2                  # 6, 6
    cols = jnp.stack(
        [x_nhwc[:, i:i + Ho, j:j + Wo, :] for i in range(_K) for j in range(_K)],
        axis=3).reshape(B, Ho, Wo, _K * _K * C)
    quads = jnp.stack(
        [cols[:, qi::2, qj::2, :] for qi in range(2) for qj in range(2)], axis=0)
    nsteps = B // _BT
    quads = quads.reshape(4, nsteps, _BT, Hp, Wp, _K * _K * C)
    quads = jnp.transpose(quads, (1, 0, 2, 3, 4, 5))
    return quads.reshape(nsteps * 4 * _BT * Hp * Wp, _K * _K * C)   # (., 18)


def _pool2_selector():
    """0/1 gather of the 4 valid pooled conv2 rows per image in the batch tile.

    Output row = p*_BS + b (p = ph*2+pw); rows with b >= _BT are all-zero padding
    so every fc1 slice starts on a sublane(8) boundary.  Column 36*b + 12*ph + 2*pw
    is the (b, 2ph, 2pw) anchor of the 6x6 conv2 grid after the shifted-window max.
    bf16 entries are exactly 0/1, so the MXU gather is lossless.
    """
    nq = _H1 * _W1 * _BT - _BS
    sel = np.zeros((4 * _BS, nq), np.float32)
    for b in range(_BT):
        for ph in range(2):
            for pw in range(2):
                sel[(ph * 2 + pw) * _BS + b, b * 36 + 12 * ph + 2 * pw] = 1.0
    return jnp.asarray(sel, jnp.bfloat16)


def prepare_params(params):
    """One-time weight prep: transpose/reorder, zero-pad to 128 lanes, cast to bf16."""
    w1, b1, w2, b2, fw1, fb1, fw2, fb2 = params
    nh = fw1.shape[0]

    def pad_cols(a):
        return jnp.pad(a, ((0, 0), (0, _LANES - a.shape[1])))

    def bias_row(b):
        return jnp.pad(b, (0, _LANES - b.shape[0])).reshape(1, _LANES).astype(jnp.float32)

    # conv weights: (Cout, Cin, kh, kw) -> ((kh, kw, Cin), padded Cout), im2col order
    w1m = pad_cols(jnp.transpose(w1, (2, 3, 1, 0)).reshape(-1, w1.shape[0])).astype(jnp.bfloat16)
    w2m = pad_cols(jnp.transpose(w2, (2, 3, 1, 0)).reshape(-1, w2.shape[0])).astype(jnp.bfloat16)

    # fc1: PyTorch flattens NCHW as idx = c*4 + (h*2 + w).  The kernel contracts one
    # pooled position p at a time over a 128-wide (padded) channel axis.
    w3 = jnp.transpose(fw1.reshape(nh, 64, 4), (2, 1, 0))          # (p, ci, hidden)
    w3 = jnp.pad(w3, ((0, 0), (0, _LANES - 64), (0, _LANES - nh)))
    w3m = w3.reshape(4 * _LANES, _LANES).astype(jnp.bfloat16)

    # fc2: (out, hidden) -> (padded hidden, padded out)
    w4m = jnp.pad(fw2.T, ((0, _LANES - fw2.shape[1]),
                          (0, _LANES - fw2.shape[0]))).astype(jnp.bfloat16)

    return (w1m, bias_row(b1), w2m, bias_row(b2), w3m, bias_row(fb1),
            w4m, bias_row(fb2), _pool2_selector())


def forward_prepared(x_nchw, prepared):
    """BaselineNet forward with pre-prepared (padded / reordered / bf16) params."""
    w1m, b1r, w2m, b2r, w3m, b3r, w4m, b4r, sel = prepared
    assert x_nchw.shape[1:] == (2, 14, 14), x_nchw.shape
    B = x_nchw.shape[0]
    B_pad = _round_up(B, _BT)
    nsteps = B_pad // _BT
    nt = _H1 * _W1 * _BT

    x = jnp.transpose(x_nchw, (0, 2, 3, 1)).astype(jnp.float32)    # NCHW -> NHWC
    if B_pad != B:
        x = jnp.pad(x, ((0, B_pad - B), (0, 0), (0, 0), (0, 0)))
    # TODO(synk): the conv1 im2col / quadrant stack is still ~a dozen tiny XLA ops
    # ahead of the kernel; folding it in-kernel needs gather-style DMAs.
    p1 = _conv1_pool_patches(x).astype(jnp.bfloat16)               # (nsteps*4*nt, 18)

    flops_step = (2 * 4 * nt * 18 * _LANES                     # conv1
                  + 2 * nt * 288 * _LANES                      # conv2
                  + 2 * sel.shape[0] * sel.shape[1] * _LANES   # pool gather
                  + 4 * 2 * _BS * _LANES * _LANES              # fc1
                  + 2 * _BS * _LANES * _LANES)                 # fc2
    weights = (sel, w1m, b1r, w2m, b2r, w3m, b3r, w4m, b4r)
    bytes_accessed = (int(p1.size) * 2 + B_pad * _LANES * 4
                      + sum(int(a.size) * a.dtype.itemsize for a in weights))

    out = pl.pallas_call(
        _fused_forward_kernel,
        out_shape=jax.ShapeDtypeStruct((B_pad, _LANES), jnp.float32),
        grid=(nsteps,),
        in_specs=[
            pl.BlockSpec((4 * nt, 18), lambda i: (i, 0)),          # per-tile patches
            pl.BlockSpec(sel.shape, lambda i: (0, 0)),
            pl.BlockSpec(w1m.shape, lambda i: (0, 0)),
            pl.BlockSpec(b1r.shape, lambda i: (0, 0)),
            pl.BlockSpec(w2m.shape, lambda i: (0, 0)),
            pl.BlockSpec(b2r.shape, lambda i: (0, 0)),
            pl.BlockSpec(w3m.shape, lambda i: (0, 0)),
            pl.BlockSpec(b3r.shape, lambda i: (0, 0)),
            pl.BlockSpec(w4m.shape, lambda i: (0, 0)),
            pl.BlockSpec(b4r.shape, lambda i: (0, 0)),
        ],
        out_specs=pl.BlockSpec((_BT, _LANES), lambda i: (i, 0)),
        scratch_shapes=[pltpu.VMEM((nt + 16, 32), jnp.bfloat16),   # a1 (+ tap slack)
                        pltpu.VMEM((nt, 288), jnp.bfloat16),       # conv2 im2col
                        pltpu.VMEM((nt, _LANES), jnp.float32)],    # conv2 pre-pool
        compiler_params=pltpu.CompilerParams(
            dimension_semantics=("parallel",)),
        cost_estimate=pl.CostEstimate(flops=int(flops_step) * nsteps,
                                      transcendentals=0,
                                      bytes_accessed=int(bytes_accessed)),
    )(p1, sel, w1m, b1r, w2m, b2r, w3m, b3r, w4m, b4r)
    return out[:B, :2]


def baseline_net_forward(x_nchw, params):
    """Convenience wrapper matching the original (x, raw PyTorch-layout params)."""
    return forward_prepared(x_nchw, prepare_params(params))


# ----------------------------- reference + init -------------------------------

def reference_forward(x_nchw, params):
    w1, b1, w2, b2, fw1, fb1, fw2, fb2 = params

    def conv(x, w, b):
        y = lax.conv_general_dilated(
            x, w, window_strides=(1, 1), padding='VALID',
            dimension_numbers=('NCHW', 'OIHW', 'NCHW'))
        return y + b[None, :, None, None]

    def pool(x):
        B, C, H, W = x.shape
        return x.reshape(B, C, H // 2, 2, W // 2, 2).max(axis=(3, 5))

    y = jnp.maximum(pool(conv(x_nchw, w1, b1)), 0.0)
    y = jnp.maximum(pool(conv(y, w2, b2)), 0.0)
    y = y.reshape(y.shape[0], -1)
    y = jnp.maximum(y @ fw1.T + fb1, 0.0)
    return y @ fw2.T + fb2


def init_params(key, nb_hidden=100):
    ks = jax.random.split(key, 8)

    def u(k, shape, fan_in):
        bound = 1.0 / jnp.sqrt(float(fan_in))
        return jax.random.uniform(k, shape, jnp.float32, -bound, bound)

    w1 = u(ks[0], (32, 2, 3, 3), 2 * 9)
    b1 = u(ks[1], (32,), 2 * 9)
    w2 = u(ks[2], (64, 32, 3, 3), 32 * 9)
    b2 = u(ks[3], (64,), 32 * 9)
    fw1 = u(ks[4], (nb_hidden, 256), 256)
    fb1 = u(ks[5], (nb_hidden,), 256)
    fw2 = u(ks[6], (2, nb_hidden), nb_hidden)
    fb2 = u(ks[7], (2,), nb_hidden)
    return (w1, b1, w2, b2, fw1, fb1, fw2, fb2)


# ----------------------------------- main --------------------------------------

if __name__ == "__main__":
    key = jax.random.PRNGKey(0)
    k_x, k_p = jax.random.split(key)

    # BaselineNet implies 14x14 inputs with 2 channels:
    # 14 -conv3-> 12 -pool2-> 6 -conv3-> 4 -pool2-> 2; 64*2*2 = 256 = fc1 in.
    x = jax.random.normal(k_x, (2, 2, 14, 14), jnp.float32)
    params = init_params(k_p, nb_hidden=100)

    prepared = prepare_params(params)          # one-time, batch-independent weight prep
    fwd = jax.jit(forward_prepared)

    out = jax.block_until_ready(fwd(x, prepared))
    assert out.shape == (2, 2), out.shape

    ref = jax.block_until_ready(reference_forward(x, params))
    # bf16 matmul operands with f32 accumulation -> slightly relaxed tolerance.
    assert jnp.allclose(out, ref, rtol=2e-2, atol=2e-2), (out, ref)

    print("KERNEL_OK")
</pallas_src>

<mosaic_0001>
module attributes {stable_mosaic.version = 11 : i64} {
  func.func @_fused_forward_kernel(%arg0: i32, %arg1: memref<288x18xbf16, #tpu.memory_space<vmem>>, %arg2: memref<32x64xbf16, #tpu.memory_space<vmem>>, %arg3: memref<18x128xbf16, #tpu.memory_space<vmem>>, %arg4: memref<1x128xf32, #tpu.memory_space<vmem>>, %arg5: memref<288x128xbf16, #tpu.memory_space<vmem>>, %arg6: memref<1x128xf32, #tpu.memory_space<vmem>>, %arg7: memref<512x128xbf16, #tpu.memory_space<vmem>>, %arg8: memref<1x128xf32, #tpu.memory_space<vmem>>, %arg9: memref<128x128xbf16, #tpu.memory_space<vmem>>, %arg10: memref<1x128xf32, #tpu.memory_space<vmem>>, %arg11: memref<2x128xf32, #tpu.memory_space<vmem>>, %arg12: memref<88x32xbf16, #tpu.memory_space<vmem>>, %arg13: memref<72x288xbf16, #tpu.memory_space<vmem>>, %arg14: memref<72x128xf32, #tpu.memory_space<vmem>>) attributes {dimension_semantics = [#tpu.dimension_semantics<parallel>], iteration_bounds = array<i64: 1>, scalar_prefetch = 0 : i64, scratch_operands = 3 : i64, tpu.core_type = #tpu.core_type<tc>, window_params = [{transform_indices = @transform_0, window_bounds = array<i64: 288, 18>}, {pipeline_mode = #tpu.pipeline_mode<synchronous>, transform_indices = @transform_1, window_bounds = array<i64: 32, 64>}, {pipeline_mode = #tpu.pipeline_mode<synchronous>, transform_indices = @transform_2, window_bounds = array<i64: 18, 128>}, {pipeline_mode = #tpu.pipeline_mode<synchronous>, transform_indices = @transform_3, window_bounds = array<i64: 1, 128>}, {pipeline_mode = #tpu.pipeline_mode<synchronous>, transform_indices = @transform_4, window_bounds = array<i64: 288, 128>}, {pipeline_mode = #tpu.pipeline_mode<synchronous>, transform_indices = @transform_5, window_bounds = array<i64: 1, 128>}, {pipeline_mode = #tpu.pipeline_mode<synchronous>, transform_indices = @transform_6, window_bounds = array<i64: 512, 128>}, {pipeline_mode = #tpu.pipeline_mode<synchronous>, transform_indices = @transform_7, window_bounds = array<i64: 1, 128>}, {pipeline_mode = #tpu.pipeline_mode<synchronous>, transform_indices = @transform_8, window_bounds = array<i64: 128, 128>}, {pipeline_mode = #tpu.pipeline_mode<synchronous>, transform_indices = @transform_9, window_bounds = array<i64: 1, 128>}, {transform_indices = @transform_10, window_bounds = array<i64: 2, 128>}]} {
    %c0 = arith.constant 0 : index
    %c0_0 = arith.constant 0 : index
    %0 = vector.load %arg3[%c0, %c0_0] : memref<18x128xbf16, #tpu.memory_space<vmem>>, vector<18x128xbf16>
    %c0_1 = arith.constant 0 : index
    %c0_2 = arith.constant 0 : index
    %1 = vector.load %arg1[%c0_1, %c0_2] : memref<288x18xbf16, #tpu.memory_space<vmem>>, vector<144x18xbf16>
    %cst = arith.constant dense<0.000000e+00> : vector<144x128xf32>
    %2 = tpu.matmul %1, %0, %cst {dimension_numbers = #tpu.dot_dimension_numbers<[1], [0], [0], [1], [0, 0, 1, 1], [], []>} : vector<144x18xbf16>, vector<18x128xbf16>, vector<144x128xf32> -> vector<144x128xf32>
    %3 = vector.extract_strided_slice %2 {offsets = [0, 0], sizes = [72, 128], strides = [1, 1]} : vector<144x128xf32> to vector<72x128xf32>
    %4 = vector.extract_strided_slice %2 {offsets = [72, 0], sizes = [72, 128], strides = [1, 1]} : vector<144x128xf32> to vector<72x128xf32>
    %5 = arith.maximumf %3, %4 : vector<72x128xf32>
    %c144 = arith.constant 144 : index
    %c0_3 = arith.constant 0 : index
    %6 = vector.load %arg1[%c144, %c0_3] : memref<288x18xbf16, #tpu.memory_space<vmem>>, vector<144x18xbf16>
    %cst_4 = arith.constant dense<0.000000e+00> : vector<144x128xf32>
    %7 = tpu.matmul %6, %0, %cst_4 {dimension_numbers = #tpu.dot_dimension_numbers<[1], [0], [0], [1], [0, 0, 1, 1], [], []>} : vector<144x18xbf16>, vector<18x128xbf16>, vector<144x128xf32> -> vector<144x128xf32>
    %8 = vector.extract_strided_slice %7 {offsets = [0, 0], sizes = [72, 128], strides = [1, 1]} : vector<144x128xf32> to vector<72x128xf32>
    %9 = vector.extract_strided_slice %7 {offsets = [72, 0], sizes = [72, 128], strides = [1, 1]} : vector<144x128xf32> to vector<72x128xf32>
    %10 = arith.maximumf %8, %9 : vector<72x128xf32>
    %11 = arith.maximumf %5, %10 : vector<72x128xf32>
    %c0_5 = arith.constant 0 : index
    %c0_6 = arith.constant 0 : index
    %12 = vector.load %arg4[%c0_5, %c0_6] : memref<1x128xf32, #tpu.memory_space<vmem>>, vector<1x128xf32>
    %13 = vector.broadcast %12 : vector<1x128xf32> to vector<72x128xf32>
    %14 = arith.addf %11, %13 : vector<72x128xf32>
    %cst_7 = arith.constant 0.000000e+00 : f32
    %15 = vector.broadcast %cst_7 : f32 to vector<72x128xf32>
    %16 = arith.maximumf %14, %15 : vector<72x128xf32>
    %17 = vector.extract_strided_slice %16 {offsets = [0, 0], sizes = [72, 32], strides = [1, 1]} : vector<72x128xf32> to vector<72x32xf32>
    %18 = arith.truncf %17 : vector<72x32xf32> to vector<72x32xbf16>
    %c0_8 = arith.constant 0 : index
    %c0_9 = arith.constant 0 : index
    %19 = vector.load %arg12[%c0_8, %c0_9] : memref<88x32xbf16, #tpu.memory_space<vmem>>, vector<72x32xbf16>
    tpu.vector_store %arg12[%c0_8, %c0_9], %18 {strides = array<i32>} : memref<88x32xbf16, #tpu.memory_space<vmem>>, vector<72x32xbf16>,
    %cst_10 = arith.constant 0.000000e+00 : bf16
    %20 = vector.broadcast %cst_10 : bf16 to vector<16x32xbf16>
    %c72 = arith.constant 72 : index
    %c0_11 = arith.constant 0 : index
    %21 = vector.load %arg12[%c72, %c0_11] : memref<88x32xbf16, #tpu.memory_space<vmem>>, vector<16x32xbf16>
    tpu.vector_store %arg12[%c72, %c0_11], %20 {strides = array<i32>} : memref<88x32xbf16, #tpu.memory_space<vmem>>, vector<16x32xbf16>,
    %c0_12 = arith.constant 0 : index
    %c0_13 = arith.constant 0 : index
    %22 = vector.load %arg12[%c0_12, %c0_13] : memref<88x32xbf16, #tpu.memory_space<vmem>>, vector<72x32xbf16>
    %c0_14 = arith.constant 0 : index
    %c0_15 = arith.constant 0 : index
    %23 = vector.load %arg13[%c0_14, %c0_15] : memref<72x288xbf16, #tpu.memory_space<vmem>>, vector<72x32xbf16>
    tpu.vector_store %arg13[%c0_14, %c0_15], %22 {strides = array<i32>} : memref<72x288xbf16, #tpu.memory_space<vmem>>, vector<72x32xbf16>,
    %c1 = arith.constant 1 : index
    %c0_16 = arith.constant 0 : index
    %24 = vector.load %arg12[%c1, %c0_16] : memref<88x32xbf16, #tpu.memory_space<vmem>>, vector<72x32xbf16>
    %c0_17 = arith.constant 0 : index
    %c32 = arith.constant 32 : index
    %25 = vector.load %arg13[%c0_17, %c32] : memref<72x288xbf16, #tpu.memory_space<vmem>>, vector<72x32xbf16>
    tpu.vector_store %arg13[%c0_17, %c32], %24 {strides = array<i32>} : memref<72x288xbf16, #tpu.memory_space<vmem>>, vector<72x32xbf16>,
    %c2 = arith.constant 2 : index
    %c0_18 = arith.constant 0 : index
    %26 = vector.load %arg12[%c2, %c0_18] : memref<88x32xbf16, #tpu.memory_space<vmem>>, vector<72x32xbf16>
    %c0_19 = arith.constant 0 : index
    %c64 = arith.constant 64 : index
    %27 = vector.load %arg13[%c0_19, %c64] : memref<72x288xbf16, #tpu.memory_space<vmem>>, vector<72x32xbf16>
    tpu.vector_store %arg13[%c0_19, %c64], %26 {strides = array<i32>} : memref<72x288xbf16, #tpu.memory_space<vmem>>, vector<72x32xbf16>,
    %c6 = arith.constant 6 : index
    %c0_20 = arith.constant 0 : index
    %28 = vector.load %arg12[%c6, %c0_20] : memref<88x32xbf16, #tpu.memory_space<vmem>>, vector<72x32xbf16>
    %c0_21 = arith.constant 0 : index
    %c96 = arith.constant 96 : index
    %29 = vector.load %arg13[%c0_21, %c96] : memref<72x288xbf16, #tpu.memory_space<vmem>>, vector<72x32xbf16>
    tpu.vector_store %arg13[%c0_21, %c96], %28 {strides = array<i32>} : memref<72x288xbf16, #tpu.memory_space<vmem>>, vector<72x32xbf16>,
    %c7 = arith.constant 7 : index
    %c0_22 = arith.constant 0 : index
    %30 = vector.load %arg12[%c7, %c0_22] : memref<88x32xbf16, #tpu.memory_space<vmem>>, vector<72x32xbf16>
    %c0_23 = arith.constant 0 : index
    %c128 = arith.constant 128 : index
    %31 = vector.load %arg13[%c0_23, %c128] : memref<72x288xbf16, #tpu.memory_space<vmem>>, vector<72x32xbf16>
    tpu.vector_store %arg13[%c0_23, %c128], %30 {strides = array<i32>} : memref<72x288xbf16, #tpu.memory_space<vmem>>, vector<72x32xbf16>,
    %c8 = arith.constant 8 : index
    %c0_24 = arith.constant 0 : index
    %32 = vector.load %arg12[%c8, %c0_24] : memref<88x32xbf16, #tpu.memory_space<vmem>>, vector<72x32xbf16>
    %c0_25 = arith.constant 0 : index
    %c160 = arith.constant 160 : index
    %33 = vector.load %arg13[%c0_25, %c160] : memref<72x288xbf16, #tpu.memory_space<vmem>>, vector<72x32xbf16>
    tpu.vector_store %arg13[%c0_25, %c160], %32 {strides = array<i32>} : memref<72x288xbf16, #tpu.memory_space<vmem>>, vector<72x32xbf16>,
    %c12 = arith.constant 12 : index
    %c0_26 = arith.constant 0 : index
    %34 = vector.load %arg12[%c12, %c0_26] : memref<88x32xbf16, #tpu.memory_space<vmem>>, vector<72x32xbf16>
    %c0_27 = arith.constant 0 : index
    %c192 = arith.constant 192 : index
    %35 = vector.load %arg13[%c0_27, %c192] : memref<72x288xbf16, #tpu.memory_space<vmem>>, vector<72x32xbf16>
    tpu.vector_store %arg13[%c0_27, %c192], %34 {strides = array<i32>} : memref<72x288xbf16, #tpu.memory_space<vmem>>, vector<72x32xbf16>,
    %c13 = arith.constant 13 : index
    %c0_28 = arith.constant 0 : index
    %36 = vector.load %arg12[%c13, %c0_28] : memref<88x32xbf16, #tpu.memory_space<vmem>>, vector<72x32xbf16>
    %c0_29 = arith.constant 0 : index
    %c224 = arith.constant 224 : index
    %37 = vector.load %arg13[%c0_29, %c224] : memref<72x288xbf16, #tpu.memory_space<vmem>>, vector<72x32xbf16>
    tpu.vector_store %arg13[%c0_29, %c224], %36 {strides = array<i32>} : memref<72x288xbf16, #tpu.memory_space<vmem>>, vector<72x32xbf16>,
    %c14 = arith.constant 14 : index
    %c0_30 = arith.constant 0 : index
    %38 = vector.load %arg12[%c14, %c0_30] : memref<88x32xbf16, #tpu.memory_space<vmem>>, vector<72x32xbf16>
    %c0_31 = arith.constant 0 : index
    %c256 = arith.constant 256 : index
    %39 = vector.load %arg13[%c0_31, %c256] : memref<72x288xbf16, #tpu.memory_space<vmem>>, vector<72x32xbf16>
    tpu.vector_store %arg13[%c0_31, %c256], %38 {strides = array<i32>} : memref<72x288xbf16, #tpu.memory_space<vmem>>, vector<72x32xbf16>,
    %c0_32 = arith.constant 0 : index
    %c0_33 = arith.constant 0 : index
    %40 = vector.load %arg13[%c0_32, %c0_33] : memref<72x288xbf16, #tpu.memory_space<vmem>>, vector<72x288xbf16>
    %c0_34 = arith.constant 0 : index
    %c0_35 = arith.constant 0 : index
    %41 = vector.load %arg5[%c0_34, %c0_35] : memref<288x128xbf16, #tpu.memory_space<vmem>>, vector<288x128xbf16>
    %cst_36 = arith.constant dense<0.000000e+00> : vector<72x128xf32>
    %42 = tpu.matmul %40, %41, %cst_36 {dimension_numbers = #tpu.dot_dimension_numbers<[1], [0], [0], [1], [0, 0, 1, 1], [], []>} : vector<72x288xbf16>, vector<288x128xbf16>, vector<72x128xf32> -> vector<72x128xf32>
    %c0_37 = arith.constant 0 : index
    %c0_38 = arith.constant 0 : index
    %43 = vector.load %arg14[%c0_37, %c0_38] : memref<72x128xf32, #tpu.memory_space<vmem>>, vector<72x128xf32>
    tpu.vector_store %arg14[%c0_37, %c0_38], %42 {strides = array<i32>} : memref<72x128xf32, #tpu.memory_space<vmem>>, vector<72x128xf32>,
    %c0_39 = arith.constant 0 : index
    %c0_40 = arith.constant 0 : index
    %44 = vector.load %arg14[%c0_39, %c0_40] : memref<72x128xf32, #tpu.memory_space<vmem>>, vector<64x128xf32>
    %c1_41 = arith.constant 1 : index
    %c0_42 = arith.constant 0 : index
    %45 = vector.load %arg14[%c1_41, %c0_42] : memref<72x128xf32, #tpu.memory_space<vmem>>, vector<64x128xf32>
    %46 = arith.maximumf %44, %45 : vector<64x128xf32>
    %c6_43 = arith.constant 6 : index
    %c0_44 = arith.constant 0 : index
    %47 = vector.load %arg14[%c6_43, %c0_44] : memref<72x128xf32, #tpu.memory_space<vmem>>, vector<64x128xf32>
    %c7_45 = arith.constant 7 : index
    %c0_46 = arith.constant 0 : index
    %48 = vector.load %arg14[%c7_45, %c0_46] : memref<72x128xf32, #tpu.memory_space<vmem>>, vector<64x128xf32>
    %49 = arith.maximumf %47, %48 : vector<64x128xf32>
    %50 = arith.maximumf %46, %49 : vector<64x128xf32>
    %c0_47 = arith.constant 0 : index
    %c0_48 = arith.constant 0 : index
    %51 = vector.load %arg6[%c0_47, %c0_48] : memref<1x128xf32, #tpu.memory_space<vmem>>, vector<1x128xf32>
    %52 = vector.broadcast %51 : vector<1x128xf32> to vector<64x128xf32>
    %53 = arith.addf %50, %52 : vector<64x128xf32>
    %cst_49 = arith.constant 0.000000e+00 : f32
    %54 = vector.broadcast %cst_49 : f32 to vector<64x128xf32>
    %55 = arith.maximumf %53, %54 : vector<64x128xf32>
    %56 = arith.truncf %55 : vector<64x128xf32> to vector<64x128xbf16>
    %c0_50 = arith.constant 0 : index
    %c0_51 = arith.constant 0 : index
    %57 = vector.load %arg2[%c0_50, %c0_51] : memref<32x64xbf16, #tpu.memory_space<vmem>>, vector<32x64xbf16>
    %cst_52 = arith.constant dense<0.000000e+00> : vector<32x128xf32>
    %58 = tpu.matmul %57, %56, %cst_52 {dimension_numbers = #tpu.dot_dimension_numbers<[1], [0], [0], [1], [0, 0, 1, 1], [], []>} : vector<32x64xbf16>, vector<64x128xbf16>, vector<32x128xf32> -> vector<32x128xf32>
    %59 = arith.truncf %58 : vector<32x128xf32> to vector<32x128xbf16>
    %60 = vector.extract_strided_slice %59 {offsets = [0, 0], sizes = [8, 128], strides = [1, 1]} : vector<32x128xbf16> to vector<8x128xbf16>
    %c0_53 = arith.constant 0 : index
    %c0_54 = arith.constant 0 : index
    %61 = vector.load %arg7[%c0_53, %c0_54] : memref<512x128xbf16, #tpu.memory_space<vmem>>, vector<128x128xbf16>
    %cst_55 = arith.constant dense<0.000000e+00> : vector<8x128xf32>
    %62 = tpu.matmul %60, %61, %cst_55 {dimension_numbers = #tpu.dot_dimension_numbers<[1], [0], [0], [1], [0, 0, 1, 1], [], []>} : vector<8x128xbf16>, vector<128x128xbf16>, vector<8x128xf32> -> vector<8x128xf32>
    %63 = vector.extract_strided_slice %59 {offsets = [8, 0], sizes = [8, 128], strides = [1, 1]} : vector<32x128xbf16> to vector<8x128xbf16>
    %c128_56 = arith.constant 128 : index
    %c0_57 = arith.constant 0 : index
    %64 = vector.load %arg7[%c128_56, %c0_57] : memref<512x128xbf16, #tpu.memory_space<vmem>>, vector<128x128xbf16>
    %cst_58 = arith.constant dense<0.000000e+00> : vector<8x128xf32>
    %65 = tpu.matmul %63, %64, %cst_58 {dimension_numbers = #tpu.dot_dimension_numbers<[1], [0], [0], [1], [0, 0, 1, 1], [], []>} : vector<8x128xbf16>, vector<128x128xbf16>, vector<8x128xf32> -> vector<8x128xf32>
    %66 = arith.addf %62, %65 : vector<8x128xf32>
    %67 = vector.extract_strided_slice %59 {offsets = [16, 0], sizes = [8, 128], strides = [1, 1]} : vector<32x128xbf16> to vector<8x128xbf16>
    %c256_59 = arith.constant 256 : index
    %c0_60 = arith.constant 0 : index
    %68 = vector.load %arg7[%c256_59, %c0_60] : memref<512x128xbf16, #tpu.memory_space<vmem>>, vector<128x128xbf16>
    %cst_61 = arith.constant dense<0.000000e+00> : vector<8x128xf32>
    %69 = tpu.matmul %67, %68, %cst_61 {dimension_numbers = #tpu.dot_dimension_numbers<[1], [0], [0], [1], [0, 0, 1, 1], [], []>} : vector<8x128xbf16>, vector<128x128xbf16>, vector<8x128xf32> -> vector<8x128xf32>
    %70 = arith.addf %66, %69 : vector<8x128xf32>
    %71 = vector.extract_strided_slice %59 {offsets = [24, 0], sizes = [8, 128], strides = [1, 1]} : vector<32x128xbf16> to vector<8x128xbf16>
    %c384 = arith.constant 384 : index
    %c0_62 = arith.constant 0 : index
    %72 = vector.load %arg7[%c384, %c0_62] : memref<512x128xbf16, #tpu.memory_space<vmem>>, vector<128x128xbf16>
    %cst_63 = arith.constant dense<0.000000e+00> : vector<8x128xf32>
    %73 = tpu.matmul %71, %72, %cst_63 {dimension_numbers = #tpu.dot_dimension_numbers<[1], [0], [0], [1], [0, 0, 1, 1], [], []>} : vector<8x128xbf16>, vector<128x128xbf16>, vector<8x128xf32> -> vector<8x128xf32>
    %74 = arith.addf %70, %73 : vector<8x128xf32>
    %c0_64 = arith.constant 0 : index
    %c0_65 = arith.constant 0 : index
    %75 = vector.load %arg8[%c0_64, %c0_65] : memref<1x128xf32, #tpu.memory_space<vmem>>, vector<1x128xf32>
    %76 = vector.broadcast %75 : vector<1x128xf32> to vector<8x128xf32>
    %77 = arith.addf %74, %76 : vector<8x128xf32>
    %cst_66 = arith.constant 0.000000e+00 : f32
    %78 = vector.broadcast %cst_66 : f32 to vector<8x128xf32>
    %79 = arith.maximumf %77, %78 : vector<8x128xf32>
    %80 = arith.truncf %79 : vector<8x128xf32> to vector<8x128xbf16>
    %c0_67 = arith.constant 0 : index
    %c0_68 = arith.constant 0 : index
    %81 = vector.load %arg9[%c0_67, %c0_68] : memref<128x128xbf16, #tpu.memory_space<vmem>>, vector<128x128xbf16>
    %cst_69 = arith.constant dense<0.000000e+00> : vector<8x128xf32>
    %82 = tpu.matmul %80, %81, %cst_69 {dimension_numbers = #tpu.dot_dimension_numbers<[1], [0], [0], [1], [0, 0, 1, 1], [], []>} : vector<8x128xbf16>, vector<128x128xbf16>, vector<8x128xf32> -> vector<8x128xf32>
    %c0_70 = arith.constant 0 : index
    %c0_71 = arith.constant 0 : index
    %83 = vector.load %arg10[%c0_70, %c0_71] : memref<1x128xf32, #tpu.memory_space<vmem>>, vector<1x128xf32>
    %84 = vector.broadcast %83 : vector<1x128xf32> to vector<8x128xf32>
    %85 = arith.addf %82, %84 : vector<8x128xf32>
    %86 = vector.extract_strided_slice %85 {offsets = [0, 0], sizes = [2, 128], strides = [1, 1]} : vector<8x128xf32> to vector<2x128xf32>
    %c0_72 = arith.constant 0 : index
    %c0_73 = arith.constant 0 : index
    %87 = vector.load %arg11[%c0_72, %c0_73] : memref<2x128xf32, #tpu.memory_space<vmem>>, vector<2x128xf32>
    tpu.vector_store %arg11[%c0_72, %c0_73], %86 {strides = array<i32>} : memref<2x128xf32, #tpu.memory_space<vmem>>, vector<2x128xf32>,
    return
  }
  func.func @transform_0(%arg0: i32) -> (i32, i32) {
    %c0_i32 = arith.constant 0 : i32
    %c0_i32_0 = arith.constant 0 : i32
    return %arg0, %c0_i32 : i32, i32
  }
  func.func @transform_1(%arg0: i32) -> (i32, i32) {
    %c0_i32 = arith.constant 0 : i32
    %c0_i32_0 = arith.constant 0 : i32
    %c0_i32_1 = arith.constant 0 : i32
    return %c0_i32, %c0_i32_0 : i32, i32
  }
  func.func @transform_2(%arg0: i32) -> (i32, i32) {
    %c0_i32 = arith.constant 0 : i32
    %c0_i32_0 = arith.constant 0 : i32
    %c0_i32_1 = arith.constant 0 : i32
    return %c0_i32, %c0_i32_0 : i32, i32
  }
  func.func @transform_3(%arg0: i32) -> (i32, i32) {
    %c0_i32 = arith.constant 0 : i32
    %c0_i32_0 = arith.constant 0 : i32
    %c0_i32_1 = arith.constant 0 : i32
    return %c0_i32, %c0_i32_0 : i32, i32
  }
  func.func @transform_4(%arg0: i32) -> (i32, i32) {
    %c0_i32 = arith.constant 0 : i32
    %c0_i32_0 = arith.constant 0 : i32
    %c0_i32_1 = arith.constant 0 : i32
    return %c0_i32, %c0_i32_0 : i32, i32
  }
  func.func @transform_5(%arg0: i32) -> (i32, i32) {
    %c0_i32 = arith.constant 0 : i32
    %c0_i32_0 = arith.constant 0 : i32
    %c0_i32_1 = arith.constant 0 : i32
    return %c0_i32, %c0_i32_0 : i32, i32
  }
  func.func @transform_6(%arg0: i32) -> (i32, i32) {
    %c0_i32 = arith.constant 0 : i32
    %c0_i32_0 = arith.constant 0 : i32
    %c0_i32_1 = arith.constant 0 : i32
    return %c0_i32, %c0_i32_0 : i32, i32
  }
  func.func @transform_7(%arg0: i32) -> (i32, i32) {
    %c0_i32 = arith.constant 0 : i32
    %c0_i32_0 = arith.constant 0 : i32
    %c0_i32_1 = arith.constant 0 : i32
    return %c0_i32, %c0_i32_0 : i32, i32
  }
  func.func @transform_8(%arg0: i32) -> (i32, i32) {
    %c0_i32 = arith.constant 0 : i32
    %c0_i32_0 = arith.constant 0 : i32
    %c0_i32_1 = arith.constant 0 : i32
    return %c0_i32, %c0_i32_0 : i32, i32
  }
  func.func @transform_9(%arg0: i32) -> (i32, i32) {
    %c0_i32 = arith.constant 0 : i32
    %c0_i32_0 = arith.constant 0 : i32
    %c0_i32_1 = arith.constant 0 : i32
    return %c0_i32, %c0_i32_0 : i32, i32
  }
  func.func @transform_10(%arg0: i32) -> (i32, i32) {
    %c0_i32 = arith.constant 0 : i32
    %c0_i32_0 = arith.constant 0 : i32
    return %arg0, %c0_i32 : i32, i32
  }
}

</mosaic_0001>

<bundles_post_ra>
// kernel: forward_prepared.1
= control target key start
LH: loop header
LB: loop body
LE: loop exit
PB: predicated region body
PF: predicated region fallthrough
CT: control target
= control target key end

     0   :  { %vm140_vm0 = vcmask 1040384   ;;  %s3522_s0 = inlined_call_operand.vmem [shape: bf16[288,18], index: 0, kind: input, shape index: {}]   ;;  %s3523_s1 = inlined_call_operand.vmem [shape: bf16[32,64], index: 1, kind: input, shape index: {}]   ;;  %s3524_s2 = inlined_call_operand.vmem [shape: bf16[18,128], index: 2, kind: input, shape index: {}]   ;;  %s3525_s3 = inlined_call_operand.vmem [shape: f32[1,128], index: 3, kind: input, shape index: {}]   ;;  %s3526_s4 = inlined_call_operand.vmem [shape: bf16[288,128], index: 4, kind: input, shape index: {}]   ;;  %s3527_s5 = inlined_call_operand.vmem [shape: f32[1,128], index: 5, kind: input, shape index: {}]   ;;  %s3528_s6 = inlined_call_operand.vmem [shape: bf16[512,128], index: 6, kind: input, shape index: {}]   ;;  %s3529_s7 = inlined_call_operand.vmem [shape: f32[1,128], index: 7, kind: input, shape index: {}]   ;;  %s3530_s8 = inlined_call_operand.vmem [shape: bf16[128,128], index: 8, kind: input, shape index: {}]   ;;  %s3531_s9 = inlined_call_operand.vmem [shape: f32[1,128], index: 9, kind: input, shape index: {}]   ;;  %s3532_s10 = inlined_call_operand.hbm [shape: f32[2,128], index: 10, kind: output, shape index: {}]  }
   0x1   :  { %v39_v0 = vld [vmem:[%s3524_s2 + $0x8] sm:$0x1] }
   0x2   :  { %v108_v1 = vunpack.c.l.b16 %v39_v0 }
   0x4   :  { %v110_v2 = vpack.c.b16 %v108_v1, %v108_v1 }
   0x5   :  { %15 = vsyncpa [#allocation6], 0  ;;  %v2509_v4 = vld [vmem:[%s3524_s2] sm:$0xff]  ;;  %v2519_v6 = vld [vmem:[%s3522_s0 + $0x48] sm:$0xff]  ;;  %vm112_vm1 = vcmask 146432   ;;  %vm400_vm2 = vcmask 257024  }
   0x6   :  { %v142_v3 = vsel %vm140_vm0, %v110_v2, 0  ;;  %v2510_v5 = vld [vmem:[%s3522_s0] sm:$0xff]  ;;  %v2511_v7 = vld [vmem:[%s3522_s0 + $0x8] sm:$0xff]  ;;  %v2520_v8 = vld [vmem:[%s3522_s0 + $0x50] sm:$0xff]  ;;  %vm683_vm3 = vcmask 1044484   ;;  %vm594_vm4 = vcmask 1042432  }
   0x7   :  { %150 = vmatpush.bf16.msra.mxu0 %v142_v3  ;;  %303 = vmatpush.bf16.msra.mxu1 %v142_v3  ;;  %v2512_v9 = vld [vmem:[%s3522_s0 + $0x10] sm:$0xff]  ;;  %v2521_v10 = vld [vmem:[%s3522_s0 + $0x58] sm:$0xff]  ;;  %v2522_v12 = vld [vmem:[%s3522_s0 + $0x60] sm:$0xff]  ;;  %vm595_vm5 = vcmask 1046532   ;;  %vm440_vm6 = vsmask.f32 3328 }
   0x8   :  { %v2513_v11 = vld [vmem:[%s3522_s0 + $0x18] sm:$0xff]  ;;  %v2514_v13 = vld [vmem:[%s3522_s0 + $0x20] sm:$0xff]  ;;  %v2523_v14 = vld [vmem:[%s3522_s0 + $0x68] sm:$0xff]  ;;  %vm441_vm8 = vsmask.f32 7440  ;;  %s2636_s12 = smov 64  }
   0x9   :  { %v2515_v15 = vld [vmem:[%s3522_s0 + $0x28] sm:$0xff]  ;;  %v2524_v16 = vld [vmem:[%s3522_s0 + $0x70] sm:$0xff]  ;;  %v2525_v18 = vld [vmem:[%s3522_s0 + $0x78] sm:$0xff]  ;;  %s2637_s13 = smov 32   ;;  %vm940_vm11 = vcmask 1041408   ;;  %vm941_vm12 = vcmask 1045508  }
   0xa   :  { %v2516_v17 = vld [vmem:[%s3522_s0 + $0x30] sm:$0xff]  ;;  %v2517_v19 = vld [vmem:[%s3522_s0 + $0x38] sm:$0xff]  ;;  %v2526_v20 = vld [vmem:[%s3522_s0 + $0x80] sm:$0xff]  ;;  %vm1017_vm13 = vsmask.f32 1280  ;;  %s2106_s17 = sshll.u32 %s3532_s10, 4  ;;  %s2107_s17 = int_to_ptr.hbm [resolvable:$true] %s2106_s17 }
   0xb   :  { %151 = vmatpush.bf16.msra.mxu0 %v2509_v4  ;;  %304 = vmatpush.bf16.msra.mxu1 %v2509_v4  ;;  %v2518_v21 = vld [vmem:[%s3522_s0 + $0x40] sm:$0xff]  ;;  %v2527_v22 = vld [vmem:[%s3522_s0 + $0x88] sm:$0xff]  ;;  %vm2810_vm7 = vmor %vm140_vm0, %vm683_vm3  ;;  %vm1018_vm14 = vsmask.f32 5392  ;;  %vm760_vm15 = vsmask.f32 256 }
   0xc   :  { %v2801_v45 = vld [vmem:[%s3525_s3] ss:$0 sm:$0xff]  ;;  %vm2817_vm9 = vmor %vm594_vm4, %vm595_vm5  ;;  %s2635_s3 = smov 96   ;;  %vm761_vm0 = vsmask.f32 4368  ;;  %vm564_vm5 = vcmask 519424  }
   0xd   :  { %vm2831_vm10 = vmor %vm440_vm6, %vm441_vm8  ;;  %vm652_vm6 = vcmask 781824   ;;  %vm740_vm8 = vcmask 1044224  }
   0xe   :  { %2155 = vmatmul.msk.bf16.vlgmr.msra.gmra.mxu0 %vm112_vm1, %v2510_v5  ;;  %2200 = vmatmul.msk.bf16.vlgmr.msra.gmra.mxu1 %vm112_vm1, %v2519_v6  ;;  %vm3028_vm3 = vmor %vm1017_vm13, %vm1018_vm14 }
   0xf   :  { %vm3053_vm4 = vmor %vm760_vm15, %vm761_vm0 }
  0x1e   :  { %2156 = vmatmul.msk.bf16.gmra.mxu0 %vm112_vm1, %v2511_v7  ;;  %2201 = vmatmul.msk.bf16.gmra.mxu1 %vm112_vm1, %v2520_v8 }
  0x2e   :  { %2157 = vmatmul.msk.bf16.gmra.mxu0 %vm112_vm1, %v2512_v9  ;;  %2202 = vmatmul.msk.bf16.gmra.mxu1 %vm112_vm1, %v2521_v10 }
  0x3e   :  { %2158 = vmatmul.msk.bf16.gmra.mxu0 %vm112_vm1, %v2513_v11  ;;  %2203 = vmatmul.msk.bf16.gmra.mxu1 %vm112_vm1, %v2522_v12 }
  0x4e   :  { %2159 = vmatmul.msk.bf16.gmra.mxu0 %vm112_vm1, %v2514_v13  ;;  %2204 = vmatmul.msk.bf16.gmra.mxu1 %vm112_vm1, %v2523_v14 }
  0x5e   :  { %2160 = vmatmul.msk.bf16.gmra.mxu0 %vm112_vm1, %v2515_v15  ;;  %2205 = vmatmul.msk.bf16.gmra.mxu1 %vm112_vm1, %v2524_v16 }
  0x6e   :  { %2161 = vmatmul.msk.bf16.gmra.mxu0 %vm112_vm1, %v2516_v17  ;;  %2206 = vmatmul.msk.bf16.gmra.mxu1 %vm112_vm1, %v2525_v18 }
  0x7e   :  { %2162 = vmatmul.msk.bf16.gmra.mxu0 %vm112_vm1, %v2517_v19  ;;  %2207 = vmatmul.msk.bf16.gmra.mxu1 %vm112_vm1, %v2526_v20 }
  0x8b   :  { %v153_v23 = vpop.f32.mrf.mxu0  ;;  %v306_v24 = vpop.f32.mrf.mxu1 }
  0x8e   :  { %2163 = vmatmul.msk.bf16.gmra.mxu0 %vm112_vm1, %v2518_v21  ;;  %2208 = vmatmul.msk.bf16.gmra.mxu1 %vm112_vm1, %v2527_v22  ;;  %vm3020_vm1 = vmor %vm940_vm11, %vm941_vm12 }
  0x93   :  { %v155_v25 = vpop.f32.mrf.mxu0  ;;  %v308_v26 = vpop.f32.mrf.mxu1 }
  0x9b   :  { %v158_v27 = vpop.f32.mrf.mxu0  ;;  %v311_v28 = vpop.f32.mrf.mxu1 }
  0xa3   :  { %v2774_v29 = vpop.f32.mrf.mxu0  ;;  %v2776_v30 = vpop.f32.mrf.mxu1 }
  0xab   :  { %v2778_v31 = vpop.f32.mrf.mxu0  ;;  %v2780_v32 = vpop.f32.mrf.mxu1 }
  0xb3   :  { %v2782_v33 = vpop.f32.mrf.mxu0  ;;  %v2784_v34 = vpop.f32.mrf.mxu1 }
  0xbb   :  { %v2786_v35 = vpop.f32.mrf.mxu0  ;;  %v2788_v36 = vpop.f32.mrf.mxu1 }
  0xc3   :  { %v2790_v37 = vpop.f32.mrf.mxu0  ;;  %v2792_v38 = vpop.f32.mrf.mxu1 }
  0xcb   :  { %v2794_v39 = vpop.f32.mrf.mxu0  ;;  %v2796_v40 = vpop.f32.mrf.mxu1 }
  0xd3   :  { %v175_v41 = vpop.f32.mrf.mxu0  ;;  %v328_v42 = vpop.f32.mrf.mxu1 }
  0xd4   :  { %v198_v43 = vmax.f32 %v153_v23, %v175_v41  ;;  %v351_v44 = vmax.f32 %v306_v24, %v328_v42 }
  0xd6   :  { %v360_v46 = vmax.f32 %v198_v43, %v351_v44 }
  0xd8   :  { %v373_v47 = vadd.f32 %v2801_v45, %v360_v46 }
  0xda   :  { %v382_v48 = vmax.f32 %v373_v47, 0.0 }
  0xdb   :  { %v178_v49 = vpop.f32.mrf.mxu0  ;;  %v331_v50 = vpop.f32.mrf.mxu1 }
  0xdc   :  { %v391_v51 = vpack.c.bf16 %v382_v48, %v382_v48  ;;  %v199_v52 = vmax.f32 %v155_v25, %v178_v49  ;;  %v352_v53 = vmax.f32 %v308_v26, %v331_v50 }
  0xde   :  { %401 = vst.msk [vmem:[#allocation2] sm:$0xf] %vm400_vm2, %v391_v51  ;;  %v361_v54 = vmax.f32 %v199_v52, %v352_v53 }
  0xe0   :  { %v374_v55 = vadd.f32 %v2801_v45, %v361_v54 }
  0xe2   :  { %v383_v56 = vmax.f32 %v374_v55, 0.0 }
  0xe3   :  { %v180_v57 = vpop.f32.mrf.mxu0  ;;  %v333_v58 = vpop.f32.mrf.mxu1 }
  0xe4   :  { %v392_v59 = vpack.c.bf16 %v383_v56, %v383_v56  ;;  %v200_v60 = vmax.f32 %v158_v27, %v180_v57  ;;  %v353_v61 = vmax.f32 %v311_v28, %v333_v58 }
  0xe5   :  { %v430_v62 = vld [vmem:[#allocation2] sm:$0xf] }
  0xe6   :  { %402 = vst.msk [vmem:[#allocation2 + $0x4] sm:$0xf] %vm400_vm2, %v392_v59  ;;  %v362_v63 = vmax.f32 %v200_v60, %v353_v61  ;;  %v444_v0 = vshrl.u32 %v430_v62, 16  ;;  %v447_v1 = vshll.u32 %v430_v62, 16  ;;  %v412_v2 = vld [vmem:[#allocation2] sm:$0xf] }
  0xe7   :  { %421 = vst.msk [vmem:[#allocation3] sm:$0xf] %vm400_vm2, %v412_v2  ;;  %v662_v4 = vld [vmem:[#allocation2] sm:$0x8] }
  0xe8   :  { %v375_v3 = vadd.f32 %v2801_v45, %v362_v63  ;;  %v574_v6 = vld [vmem:[#allocation2] sm:$0xe]  ;;  %v446_v7 = vrot.slane %v444_v0, 4  ;;  %v449_v8 = vrot.slane %v447_v1, 5  ;;  %v2210_v16 = vrot.slane %v662_v4, 11 }
  0xe9   :  { %v2209_v19 = vrot.slane %v574_v6, 9 }
  0xea   :  { %v384_v5 = vmax.f32 %v375_v3, 0.0  ;;  %v450_v23 = vor.u32 %v449_v8, %v446_v7 }
  0xeb   :  { %v183_v9 = vpop.f32.mrf.mxu0  ;;  %v336_v10 = vpop.f32.mrf.mxu1 }
  0xec   :  { %v393_v12 = vpack.c.bf16 %v384_v5, %v384_v5  ;;  %v201_v13 = vmax.f32 %v2774_v29, %v183_v9  ;;  %v354_v14 = vmax.f32 %v2776_v30, %v336_v10  ;;  %v451_v43 = vrot.slane %v450_v23, 4 }
  0xed   :  { %v663_v15 = vld [vmem:[#allocation2 + $0x4] sm:$0xf] }
  0xee   :  { %v575_v17 = vld [vmem:[#allocation2 + $0x4] sm:$0xf]  ;;  %403 = vst.msk [vmem:[#allocation2 + $0x8] sm:$0xf] %vm400_vm2, %v393_v12  ;;  %v363_v20 = vmax.f32 %v201_v13, %v354_v14  ;;  %v687_v21 = vrot.slane %v663_v15, 7 }
  0xef   :  { %v599_v22 = vrot.slane %v575_v17, 5  ;;  %v431_v24 = vld [vmem:[#allocation2 + $0x4] sm:$0xf] }
  0xf0   :  { %v376_v25 = vadd.f32 %v2801_v45, %v363_v20  ;;  %v688_v26 = vsel %vm2810_vm7, %v2210_v16, %v687_v21  ;;  %v453_v28 = vshll.u32 %v431_v24, 16  ;;  %v457_v30 = vshrl.u32 %v431_v24, 16  ;;  %v413_v41 = vld [vmem:[#allocation2 + $0x4] sm:$0xf] }
  0xf1   :  { %v600_v27 = vsel %vm2817_vm9, %v2209_v19, %v599_v22  ;;  %713 = vrot.lane.b32.xlu2 %v688_v26, %s2635_s3  ;;  %422 = vst.msk [vmem:[#allocation3 + $0xc] sm:$0xf] %vm400_vm2, %v413_v41  ;;  %v689_v54 = vrot.slane %v687_v21, 4  ;;  %v601_v58 = vrot.slane %v599_v22, 4 }
  0xf2   :  { %625 = vrot.lane.b32.xlu1 %v600_v27, %s2636_s12  ;;  %v385_v42 = vmax.f32 %v376_v25, 0.0  ;;  %v455_v44 = vrot.slane %v453_v28, 5  ;;  %v459_v47 = vrot.slane %v457_v30, 4 }
  0xf3   :  { %v338_v46 = vpop.f32.mrf.mxu1  ;;  %v185_v48 = vpop.f32.mrf.mxu0 }
  0xf4   :  { %v394_v49 = vpack.c.bf16 %v385_v42, %v385_v42  ;;  %v355_v50 = vmax.f32 %v2780_v32, %v338_v46  ;;  %v456_v51 = vsel %vm2831_vm10, %v451_v43, %v455_v44  ;;  %v202_v52 = vmax.f32 %v2778_v31, %v185_v48 }
  0xf5   :  { %537 = vrot.lane.b32.xlu0 %v456_v51, %s2637_s13  ;;  %v664_v53 = vld [vmem:[#allocation2 + $0x8] sm:$0xf]  ;;  %v460_v61 = vor.u32 %v459_v47, %v455_v44  ;;  %v2638_v44 = vmov 0  }
  0xf6   :  { %v576_v55 = vld [vmem:[#allocation2 + $0x8] sm:$0xf]  ;;  %404 = vst.msk [vmem:[#allocation2 + $0xc] sm:$0xf] %vm400_vm2, %v394_v49  ;;  %v364_v56 = vmax.f32 %v202_v52, %v355_v50  ;;  %v690_v57 = vrot.slane %v664_v53, 7 }
  0xf7   :  { %v602_v59 = vrot.slane %v576_v55, 5  ;;  %v432_v60 = vld [vmem:[#allocation2 + $0x8] sm:$0xf]  ;;  %v461_v4 = vrot.slane %v460_v61, 4  ;;  %410 = vst.msk [vmem:[#allocation2 + $0x24] sm:$0xf] %vm400_vm2, %v2638_v44 }
  0xf8   :  { %v377_v32 = vadd.f32 %v2801_v45, %v364_v56  ;;  %v691_v62 = vsel %vm2810_vm7, %v689_v54, %v690_v57  ;;  %v463_v63 = vshll.u32 %v432_v60, 16  ;;  %v467_v0 = vshrl.u32 %v432_v60, 16  ;;  %v414_v1 = vld [vmem:[#allocation2 + $0x8] sm:$0xf]  ;;  %411 = vst.msk [vmem:[#allocation2 + $0x28] sm:$0xf] %vm400_vm2, %v2638_v44 }
  0xf9   :  { %v603_v31 = vsel %vm2817_vm9, %v601_v58, %v602_v59  ;;  %715 = vrot.lane.b32.xlu2 %v691_v62, %s2635_s3  ;;  %423 = vst.msk [vmem:[#allocation3 + $0x18] sm:$0xf] %vm400_vm2, %v414_v1  ;;  %v692_v14 = vrot.slane %v690_v57, 4  ;;  %v604_v19 = vrot.slane %v602_v59, 4 }
  0xfa   :  { %627 = vrot.lane.b32.xlu1 %v603_v31, %s2636_s12  ;;  %v386_v2 = vmax.f32 %v377_v32, 0.0  ;;  %v465_v5 = vrot.slane %v463_v63, 5  ;;  %v469_v7 = vrot.slane %v467_v0, 4 }
  0xfb   :  { %v341_v3 = vpop.f32.mrf.mxu1  ;;  %v188_v6 = vpop.f32.mrf.mxu0 }
  0xfc   :  { %v395_v8 = vpack.c.bf16 %v386_v2, %v386_v2  ;;  %v356_v9 = vmax.f32 %v2784_v34, %v341_v3  ;;  %v203_v10 = vmax.f32 %v2782_v33, %v188_v6  ;;  %v466_v12 = vsel %vm2831_vm10, %v461_v4, %v465_v5 }
  0xfd   :  { %v665_v13 = vld [vmem:[#allocation2 + $0xc] sm:$0xf]  ;;  %539 = vrot.lane.b32.xlu0 %v466_v12, %s2637_s13  ;;  %v470_v22 = vor.u32 %v469_v7, %v465_v5 }
  0xfe   :  { %v577_v15 = vld [vmem:[#allocation2 + $0xc] sm:$0xf]  ;;  %405 = vst.msk [vmem:[#allocation2 + $0x10] sm:$0xf] %vm400_vm2, %v395_v8  ;;  %v365_v16 = vmax.f32 %v203_v10, %v356_v9  ;;  %v693_v17 = vrot.slane %v665_v13, 7 }
  0xff   :  { %v605_v20 = vrot.slane %v577_v15, 5  ;;  %v433_v21 = vld [vmem:[#allocation2 + $0xc] sm:$0xf]  ;;  %v471_v30 = vrot.slane %v470_v22, 4 }
 0x100   :  { %v378_v34 = vadd.f32 %v2801_v45, %v365_v16  ;;  %v694_v33 = vsel %vm2810_vm7, %v692_v14, %v693_v17  ;;  %v473_v24 = vshll.u32 %v433_v21, 16  ;;  %v477_v25 = vshrl.u32 %v433_v21, 16  ;;  %v415_v26 = vld [vmem:[#allocation2 + $0xc] sm:$0xf] }
 0x101   :  { %v606_v23 = vsel %vm2817_vm9, %v604_v19, %v605_v20  ;;  %424 = vst.msk [vmem:[#allocation3 + $0x24] sm:$0xf] %vm400_vm2, %v415_v26  ;;  %v695_v52 = vrot.slane %v693_v17, 4  ;;  %v607_v32 = vrot.slane %v605_v20, 4  ;;  %v750_v20 = vld [vmem:[#allocation2] sm:$0x8] }
 0x102   :  { %717 = vrot.lane.b32.xlu1 %v694_v33, %s2635_s3  ;;  %629 = vrot.lane.b32.xlu2 %v606_v23, %s2636_s12  ;;  %v387_v27 = vmax.f32 %v378_v34, 0.0  ;;  %v475_v41 = vrot.slane %v473_v24, 5  ;;  %v479_v43 = vrot.slane %v477_v25, 4 }
 0x103   :  { %v343_v28 = vpop.f32.mrf.mxu1  ;;  %v190_v42 = vpop.f32.mrf.mxu0 }
 0x104   :  { %v396_v46 = vpack.c.bf16 %v387_v27, %v387_v27  ;;  %v357_v47 = vmax.f32 %v2788_v36, %v343_v28  ;;  %v204_v48 = vmax.f32 %v2786_v35, %v190_v42  ;;  %v476_v49 = vsel %vm2831_vm10, %v471_v30, %v475_v41 }
 0x105   :  { %v666_v50 = vld [vmem:[#allocation2 + $0x10] sm:$0xf]  ;;  %541 = vrot.lane.b32.xlu0 %v476_v49, %s2637_s13  ;;  %v480_v56 = vor.u32 %v479_v43, %v475_v41  ;;  %v764_v42 = vshrl.u32 %v750_v20, 16  ;;  %v2904_v49 = vld [vmem:[#allocation2 + $0x8] sm:$0xf] }
 0x106   :  { %406 = vst.msk [vmem:[#allocation2 + $0x14] sm:$0xf] %vm400_vm2, %v396_v46  ;;  %v366_v51 = vmax.f32 %v204_v48, %v357_v47  ;;  %v696_v53 = vrot.slane %v666_v50, 7  ;;  %v578_v54 = vld [vmem:[#allocation2 + $0x10] sm:$0xf] }
 0x107   :  { %v434_v55 = vld [vmem:[#allocation2 + $0x10] sm:$0xf]  ;;  %v608_v57 = vrot.slane %v578_v54, 5  ;;  %v481_v62 = vrot.slane %v480_v56, 4  ;;  %v2902_v46 = vld [vmem:[#allocation2 + $0x4] sm:$0x8] }
 0x108   :  { %v379_v36 = vadd.f32 %v2801_v45, %v366_v51  ;;  %v697_v35 = vsel %vm2810_vm7, %v695_v52, %v696_v53  ;;  %v483_v58 = vshll.u32 %v434_v55, 16  ;;  %v487_v59 = vshrl.u32 %v434_v55, 16  ;;  %v416_v19 = vld [vmem:[#allocation2 + $0x10] sm:$0xf]  ;;  %v1008_v56 = vld [vmem:[#allocation2 + $0x8] sm:$0xf] }
 0x109   :  { %v609_v4 = vsel %vm2817_vm9, %v607_v32, %v608_v57  ;;  %v610_v8 = vrot.slane %v608_v57, 4  ;;  %v698_v22 = vrot.slane %v696_v53, 4  ;;  %425 = vst.msk [vmem:[#allocation3 + $0x30] sm:$0xf] %vm400_vm2, %v416_v19  ;;  %v2913_v57 = vld [vmem:[#allocation2 + $0xc] sm:$0xf] }
 0x10a   :  { %719 = vrot.lane.b32.xlu2 %v697_v35, %s2635_s3  ;;  %v388_v60 = vmax.f32 %v379_v36, 0.0  ;;  %v485_v31 = vrot.slane %v483_v58, 5  ;;  %v489_v0 = vrot.slane %v487_v59, 4  ;;  %v2910_v36 = vrot.slane %v764_v42, 11  ;;  %v2915_v59 = vld [vmem:[#allocation2 + $0x4] sm:$0xc] }
 0x10b   :  { %v346_v61 = vpop.f32.mrf.mxu1  ;;  %v193_v63 = vpop.f32.mrf.mxu0  ;;  %v2213_v35 = vrot.slane %v2902_v46, 11  ;;  %v2947_v20 = vld [vmem:[#allocation2 + $0xc] sm:$0xf] }
 0x10c   :  { %v397_v1 = vpack.c.bf16 %v388_v60, %v388_v60  ;;  %v358_v2 = vmax.f32 %v2792_v38, %v346_v61  ;;  %v205_v3 = vmax.f32 %v2790_v37, %v193_v63  ;;  %v486_v5 = vsel %vm2831_vm10, %v481_v62, %v485_v31 }
 0x10d   :  { %v579_v6 = vld [vmem:[#allocation2 + $0x14] sm:$0xf]  ;;  %631 = vrot.lane.b32.xlu0 %v609_v4, %s2636_s12  ;;  %543 = vrot.lane.b32.xlu1 %v486_v5, %s2637_s13  ;;  %v490_v12 = vor.u32 %v489_v0, %v485_v31  ;;  %v1176_v62 = vrot.slane %v2904_v49, 7  ;;  %v1030_v63 = vshrl.u32 %v1008_v56, 16  ;;  %v2919_v0 = vld [vmem:[#allocation2 + $0x4] sm:$0xc] }
 0x10e   :  { %407 = vst.msk [vmem:[#allocation2 + $0x18] sm:$0xf] %vm400_vm2, %v397_v1  ;;  %v367_v7 = vmax.f32 %v205_v3, %v358_v2  ;;  %v611_v9 = vrot.slane %v579_v6, 5  ;;  %v667_v10 = vld [vmem:[#allocation2 + $0x14] sm:$0xf]  ;;  %v1179_v2 = vrot.slane %v2913_v57, 7 }
 0x10f   :  { %v435_v38 = vld [vmem:[#allocation2 + $0x14] sm:$0xf]  ;;  %v699_v14 = vrot.slane %v667_v10, 7  ;;  %v491_v34 = vrot.slane %v490_v12, 4  ;;  %v2921_v1 = vld [vmem:[#allocation2 + $0x4] sm:$0xf] }
 0x110   :  { %v380_v37 = vadd.f32 %v2801_v45, %v367_v7  ;;  %v612_v13 = vsel %vm2817_vm9, %v610_v8, %v611_v9  ;;  %v493_v15 = vshll.u32 %v435_v38, 16  ;;  %v497_v16 = vshrl.u32 %v435_v38, 16  ;;  %v417_v52 = vld [vmem:[#allocation2 + $0x14] sm:$0xf]  ;;  %v2930_v6 = vld [vmem:[#allocation2 + $0x8] sm:$0xf] }
 0x111   :  { %v700_v28 = vsel %vm2810_vm7, %v698_v22, %v699_v14  ;;  %v701_v44 = vrot.slane %v699_v14, 4  ;;  %426 = vst.msk [vmem:[#allocation3 + $0x3c] sm:$0xf] %vm400_vm2, %v417_v52  ;;  %v1033_v7 = vshll.u32 %v1008_v56, 16  ;;  %v945_v19 = vrot.slane %v2930_v6, 6 }
 0x112   :  { %633 = vrot.lane.b32.xlu2 %v612_v13, %s2636_s12  ;;  %v389_v17 = vmax.f32 %v380_v37, 0.0  ;;  %v495_v33 = vrot.slane %v493_v15, 5  ;;  %v499_v24 = vrot.slane %v497_v16, 4  ;;  %v2212_v37 = vrot.slane %v2915_v59, 10  ;;  %v2995_v49 = vld [vmem:[#allocation2 + $0x24] sm:$0x7] }
 0x113   :  { %v348_v21 = vpop.f32.mrf.mxu1  ;;  %v195_v23 = vpop.f32.mrf.mxu0  ;;  %v1021_v13 = vshrl.u32 %v2919_v0, 16  ;;  %v2940_v15 = vrot.slane %v1176_v62, 4  ;;  %v711_v18 = vrot.slane %v2995_v49, 7 }
 0x114   :  { %v398_v25 = vpack.c.bf16 %v389_v17, %v389_v17  ;;  %v359_v26 = vmax.f32 %v2796_v40, %v348_v21  ;;  %v206_v27 = vmax.f32 %v2794_v39, %v195_v23  ;;  %v496_v30 = vsel %vm2831_vm10, %v491_v34, %v495_v33  ;;  %v1015_v34 = vld [vmem:[#allocation2 + $0x24] sm:$0xf] }
 0x115   :  { %v2896_v41 = vld [vmem:[#allocation2 + $0x18] sm:$0xf]  ;;  %721 = vrot.lane.b32.xlu1 %v700_v28, %s2635_s3  ;;  %545 = vrot.lane.b32.xlu0 %v496_v30, %s2637_s13  ;;  %v500_v48 = vor.u32 %v499_v24, %v495_v33  ;;  %v2950_v33 = vrot.slane %v1030_v63, 6  ;;  %v769_v23 = vshrl.u32 %v2921_v1, 16  ;;  %v2955_v24 = vrot.slane %v1179_v2, 4 }
 0x116   :  { %408 = vst.msk [vmem:[#allocation2 + $0x1c] sm:$0xf] %vm400_vm2, %v398_v25  ;;  %v368_v43 = vmax.f32 %v206_v27, %v359_v26  ;;  %v702_v40 = vrot.slane %v2896_v41, 7  ;;  %v580_v39 = vld [vmem:[#allocation2 + $0x18] sm:$0xf]  ;;  %v2957_v27 = vrot.slane %v1033_v7, 7 }
 0x117   :  { %v436_v47 = vld [vmem:[#allocation2 + $0x18] sm:$0xf]  ;;  %v614_v53 = vrot.slane %v580_v39, 5  ;;  %v501_v60 = vrot.slane %v500_v48, 4  ;;  %v2960_v28 = vld [vmem:[#allocation2 + $0x10] sm:$0xf] }
 0x118   :  { %v381_v50 = vadd.f32 %v2801_v45, %v368_v43  ;;  %v703_v51 = vsel %vm2810_vm7, %v701_v44, %v702_v40  ;;  %v503_v54 = vshll.u32 %v436_v47, 16  ;;  %v507_v55 = vshrl.u32 %v436_v47, 16  ;;  %v418_v14 = vld [vmem:[#allocation2 + $0x18] sm:$0xf]  ;;  %v1016_v44 = vld [vmem:[#allocation2 + $0x28] sm:$0x7] }
 0x119   :  { %v613_v45 = vrot.slane %v611_v9, 4  ;;  %v616_v8 = vrot.slane %v614_v53, 4  ;;  %427 = vst.msk [vmem:[#allocation3 + $0x48] sm:$0xf] %vm400_vm2, %v418_v14  ;;  %v704_v30 = vrot.slane %v702_v40, 4  ;;  %v1100_v39 = vshrl.u32 %v1015_v34, 16 }
 0x11a   :  { %723 = vrot.lane.b32.xlu2 %v703_v51, %s2635_s3  ;;  %v390_v58 = vmax.f32 %v381_v50, 0.0  ;;  %v505_v61 = vrot.slane %v503_v54, 5  ;;  %v509_v32 = vrot.slane %v507_v55, 4  ;;  %v1040_v47 = vshrl.u32 %v2947_v20, 16  ;;  %v2997_v46 = vld [vmem:[#allocation2 + $0x18] sm:$0xf] }
 0x11b   :  { %v615_v3 = vsel %vm2817_vm9, %v613_v45, %v614_v53  ;;  %v1103_v53 = vshll.u32 %v1015_v34, 16  ;;  %v1043_v40 = vshll.u32 %v2947_v20, 16  ;;  %v1182_v63 = vrot.slane %v2960_v28, 7 }
 0x11c   :  { %v399_v31 = vpack.c.bf16 %v390_v58, %v390_v58  ;;  %v506_v4 = vsel %vm2831_vm10, %v501_v60, %v505_v61  ;;  %v510_v38 = vor.u32 %v509_v32, %v505_v61  ;;  %v583_v58 = vld [vmem:[#allocation2 + $0x24] sm:$0x1]  ;;  %v1110_v32 = vshrl.u32 %v1016_v44, 16 }
 0x11d   :  { %v2928_v5 = vld [vmem:[#allocation2 + $0x1c] sm:$0xf]  ;;  %635 = vrot.lane.b32.xlu0 %v615_v3, %s2636_s12  ;;  %547 = vrot.lane.b32.xlu1 %v506_v4, %s2637_s13  ;;  %v439_v61 = vld [vmem:[#allocation2 + $0x24] sm:$0x1]  ;;  %v1102_v7 = vrot.slane %v1100_v39, 6  ;;  %v1105_v14 = vrot.slane %v1103_v53, 7  ;;  %v1177_v34 = vsel %vm2810_vm7, %v2213_v35, %v1176_v62  ;;  %v1183_v57 = vsel %vm2810_vm7, %v2955_v24, %v1182_v63 }
 0x11e   :  { %409 = vst.msk [vmem:[#allocation2 + $0x20] sm:$0xf] %vm400_vm2, %v399_v31  ;;  %v617_v9 = vrot.slane %v2928_v5, 5  ;;  %v669_v10 = vld [vmem:[#allocation2 + $0x1c] sm:$0xf]  ;;  %v511_v25 = vrot.slane %v510_v38, 4  ;;  %v1036_v20 = vor.u32 %v2957_v27, %v2950_v33 }
 0x11f   :  { %v437_v12 = vld [vmem:[#allocation2 + $0x1c] sm:$0xf]  ;;  %v705_v21 = vrot.slane %v669_v10, 7  ;;  %v1113_v31 = vshll.u32 %v1016_v44, 16  ;;  %v1106_v5 = vor.u32 %v1105_v14, %v1102_v7  ;;  %1211 = vst.msk [vmem:[#allocation3 + $0x8] sm:$0xf] %vm400_vm2, %v1177_v34 }
 0x120   :  { %v618_v16 = vsel %vm2817_vm9, %v616_v8, %v617_v9  ;;  %v513_v17 = vshll.u32 %v437_v12, 16  ;;  %v517_v22 = vshrl.u32 %v437_v12, 16  ;;  %v419_v42 = vld [vmem:[#allocation2 + $0x1c] sm:$0xf]  ;;  %v928_v8 = vld [vmem:[#allocation2 + $0x24] sm:$0xf] }
 0x121   :  { %428 = vst.msk [vmem:[#allocation3 + $0x54] sm:$0xf] %vm400_vm2, %v419_v42  ;;  %v706_v48 = vsel %vm2810_vm7, %v704_v30, %v705_v21  ;;  %v707_v54 = vrot.slane %v705_v21, 4  ;;  %v533_v21 = vshll.u32 %v439_v61, 16  ;;  %v1112_v30 = vrot.slane %v1110_v32, 6 }
 0x122   :  { %637 = vrot.lane.b32.xlu2 %v618_v16, %s2636_s12  ;;  %v515_v26 = vrot.slane %v513_v17, 5  ;;  %v519_v41 = vrot.slane %v517_v22, 4  ;;  %v623_v17 = vrot.slane %v583_v58, 5  ;;  %v929_v22 = vld [vmem:[#allocation2 + $0x28] sm:$0x3]  ;;  %v966_v39 = vrot.slane %v928_v8, 6 }
 0x123   :  { %v535_v58 = vrot.slane %v533_v21, 5  ;;  %v1188_v7 = vrot.slane %v2997_v46, 7  ;;  %v753_v34 = vld [vmem:[#allocation2 + $0xc] sm:$0xf]  ;;  %1213 = vst.msk [vmem:[#allocation3 + $0x20] sm:$0xf] %vm400_vm2, %v1183_v57 }
 0x124   :  { %v516_v43 = vsel %vm2831_vm10, %v511_v25, %v515_v26  ;;  %v520_v52 = vor.u32 %v519_v41, %v515_v26  ;;  %v619_v25 = vrot.slane %v617_v9, 4  ;;  %v1115_v41 = vrot.slane %v1113_v31, 7  ;;  %v922_v33 = vld [vmem:[#allocation2 + $0xc] sm:$0xf] }
 0x125   :  { %v2968_v50 = vld [vmem:[#allocation2 + $0x20] sm:$0xf]  ;;  %725 = vrot.lane.b32.xlu1 %v706_v48, %s2635_s3  ;;  %549 = vrot.lane.b32.xlu0 %v516_v43, %s2637_s13  ;;  %v2993_v43 = vld [vmem:[#allocation2 + $0x14] sm:$0xf]  ;;  %v3004_v48 = vrot.slane %v1182_v63, 4  ;;  %v1038_v27 = vrot.slane %v1036_v20, 4 }
 0x126   :  { %v582_v51 = vld [vmem:[#allocation2 + $0x20] sm:$0xf]  ;;  %v708_v55 = vrot.slane %v2968_v50, 7  ;;  %v521_v10 = vrot.slane %v520_v52, 4  ;;  %v969_v52 = vrot.slane %v929_v22, 6  ;;  %v2546_v63 = vld [vmem:[%s3526_s4 + $0x30] sm:$0xff] }
 0x127   :  { %v438_v56 = vld [vmem:[#allocation2 + $0x20] sm:$0xf]  ;;  %v620_v4 = vrot.slane %v582_v51, 5  ;;  %v968_v51 = vrot.slane %v966_v39, 4 }
 0x128   :  { %v523_v45 = vshll.u32 %v438_v56, 16  ;;  %v527_v60 = vshrl.u32 %v438_v56, 16  ;;  %v709_v3 = vsel %vm2810_vm7, %v707_v54, %v708_v55  ;;  %v420_v16 = vld [vmem:[#allocation2 + $0x20] sm:$0xf]  ;;  %v1185_v56 = vrot.slane %v2993_v43, 7 }
 0x129   :  { %429 = vst.msk [vmem:[#allocation3 + $0x60] sm:$0xf] %vm400_vm2, %v420_v16  ;;  %v2991_v42 = vld [vmem:[#allocation2 + $0x20] sm:$0xf]  ;;  %v622_v44 = vrot.slane %v620_v4, 4  ;;  %v621_v35 = vsel %vm2817_vm9, %v619_v25, %v620_v4  ;;  %v3034_v16 = vsel %vm3020_vm1, %v968_v51, %v969_v52  ;;  %v946_v43 = vsel %vm3020_vm1, %v2212_v37, %v945_v19 }
 0x12a   :  { %727 = vrot.lane.b32.xlu2 %v709_v3, %s2635_s3  ;;  %v525_v38 = vrot.slane %v523_v45, 5  ;;  %v529_v12 = vrot.slane %v527_v60, 4  ;;  %v1014_v9 = vld [vmem:[#allocation2 + $0x20] sm:$0xf]  ;;  %v963_v53 = vrot.slane %v2991_v42, 6  ;;  %v1108_v45 = vrot.slane %v1106_v5, 4 }
 0x12b   :  { %v3009_v54 = vld [vmem:[#allocation2 + $0x20] sm:$0xf]  ;;  %v1116_v60 = vor.u32 %v1115_v41, %v1112_v30  ;;  %v624_v61 = vsel %vm2817_vm9, %v622_v44, %v623_v17  ;;  %v1090_v32 = vshrl.u32 %v1014_v9, 16  ;;  %v1093_v31 = vshll.u32 %v1014_v9, 16  ;;  %v759_v4 = vld [vmem:[#allocation2 + $0x24] sm:$0xf] }
 0x12c   :  { %v526_v26 = vsel %vm2831_vm10, %v521_v10, %v525_v38  ;;  %v530_v62 = vor.u32 %v529_v12, %v525_v38  ;;  %v965_v3 = vrot.slane %v963_v53, 4  ;;  %v832_v38 = vshrl.u32 %v3009_v54, 16  ;;  %v752_v12 = vld [vmem:[#allocation2 + $0x8] sm:$0xf]  ;;  %v874_v25 = vld [vmem:[#allocation2 + $0x24] sm:$0xf] }
 0x12d   :  { %639 = vrot.lane.b32.xlu0 %v621_v35, %s2636_s12  ;;  %551 = vrot.lane.b32.xlu1 %v526_v26, %s2637_s13  ;;  %v1092_v17 = vrot.slane %v1090_v32, 6  ;;  %v1095_v21 = vrot.slane %v1093_v31, 7  ;;  %v1117_v26 = vsel %vm3028_vm3, %v1108_v45, %v1116_v60  ;;  %v841_v41 = vshrl.u32 %v759_v4, 16  ;;  %v754_v32 = vld [vmem:[#allocation2 + $0x10] sm:$0xf] }
 0x12e   :  { %v531_v8 = vrot.slane %v530_v62, 4  ;;  %v3038_v22 = vsel %vm3020_vm1, %v965_v3, %v966_v39  ;;  %v3042_v30 = vrot.slane %v832_v38, 7  ;;  %v844_v44 = vshll.u32 %v759_v4, 16  ;;  %v755_v38 = vld [vmem:[#allocation2 + $0x14] sm:$0xf] }
 0x12f   :  { %v3044_v35 = vor.u32 %v1095_v21, %v1092_v17  ;;  %v771_v62 = vrot.slane %v769_v23, 7  ;;  %v772_v9 = vshll.u32 %v2921_v1, 16  ;;  %v778_v51 = vshrl.u32 %v752_v12, 16 }
 0x130   :  { %v536_v39 = vsel %vm2831_vm10, %v531_v8, %v535_v58  ;;  %v839_v45 = vrot.slane %v3042_v30, 4  ;;  %v843_v60 = vrot.slane %v841_v41, 7  ;;  %v710_v1 = vrot.slane %v708_v55, 4  ;;  %v2547_v55 = vld [vmem:[%s3526_s4 + $0x38] sm:$0xff] }
 0x131   :  { %v1098_v29 = vrot.slane %v3044_v35, 4  ;;  %v774_v23 = vor.u32 %v772_v9, %v771_v62  ;;  %v781_v58 = vshll.u32 %v752_v12, 16  ;;  %v780_v3 = vrot.slane %v778_v51, 7  ;;  %1468 = vmatpush.bf16.msra.mxu2 %v2547_v55 }
 0x132   :  { %641 = vrot.lane.b32.xlu2 %v624_v61, %s2636_s12  ;;  %v787_v61 = vshrl.u32 %v753_v34, 16  ;;  %v846_v31 = vor.u32 %v844_v44, %v843_v60  ;;  %v790_v8 = vshll.u32 %v753_v34, 16  ;;  %v796_v50 = vshrl.u32 %v754_v32, 16 }
 0x133   :  { %v3065_v17 = vsel %vm3028_vm3, %v1098_v29, %v1106_v5  ;;  %v775_v21 = vsel %vm3053_vm4, %v2910_v36, %v774_v23  ;;  %v783_v34 = vor.u32 %v781_v58, %v780_v3  ;;  %v785_v5 = vrot.slane %v780_v3, 4  ;;  %v1160_v58 = vld [vmem:[#allocation2 + $0x1c] sm:$0xf] }
 0x134   :  { %v789_v4 = vrot.slane %v787_v61, 7  ;;  %v847_v12 = vsel %vm3053_vm4, %v839_v45, %v846_v31  ;;  %857 = vst.msk [vmem:[#allocation3 + $0x4] sm:$0xf] %vm400_vm2, %v775_v21  ;;  %v798_v44 = vrot.slane %v796_v50, 7  ;;  %v799_v36 = vshll.u32 %v754_v32, 16 }
 0x135   :  { %553 = vrot.lane.b32.xlu0 %v536_v39, %s2637_s13  ;;  %900 = vrot.lane.b32.xlu1 %v874_v25, %s2637_s13  ;;  %v776_v25 = vrot.slane %v771_v62, 4  ;;  %865 = vst.msk [vmem:[#allocation3 + $0x64] sm:$0xf] %vm400_vm2, %v847_v12  ;;  %v805_v62 = vshrl.u32 %v755_v38, 16  ;;  %v756_v45 = vld [vmem:[#allocation2 + $0x18] sm:$0xf]  ;;  %v712_v29 = vsel %vm2810_vm7, %v710_v1, %v711_v18  ;;  %v1186_v24 = vsel %vm2810_vm7, %v3004_v48, %v1185_v56 }
 0x136   :  { %v792_v41 = vor.u32 %v790_v8, %v789_v4  ;;  %v794_v39 = vrot.slane %v789_v4, 4  ;;  %v808_v60 = vshll.u32 %v755_v38, 16  ;;  %v814_v61 = vshrl.u32 %v756_v45, 16  ;;  %1469 = vmatpush.bf16.msra.mxu2 %v2546_v63  ;;  %1214 = vst.msk [vmem:[#allocation3 + $0x2c] sm:$0xf] %vm400_vm2, %v1186_v24 }
 0x137   :  { %v784_v9 = vsel %vm3053_vm4, %v776_v25, %v783_v34  ;;  %v1187_v32 = vrot.slane %v1185_v56, 4  ;;  %v803_v28 = vrot.slane %v798_v44, 4  ;;  %v817_v23 = vshll.u32 %v756_v45, 16  ;;  %v757_v21 = vld [vmem:[#allocation2 + $0x1c] sm:$0xf] }
 0x138   :  { %v793_v51 = vsel %vm3053_vm4, %v785_v5, %v792_v41  ;;  %858 = vst.msk [vmem:[#allocation3 + $0x10] sm:$0xf] %vm400_vm2, %v784_v9  ;;  %v816_v1 = vrot.slane %v814_v61, 7  ;;  %v1042_v48 = vrot.slane %v1040_v47, 6  ;;  %v1024_v56 = vshll.u32 %v2919_v0, 16  ;;  %v2545_v47 = vld [vmem:[%s3526_s4 + $0x28] sm:$0xff] }
 0x139   :  { %859 = vst.msk [vmem:[#allocation3 + $0x1c] sm:$0xf] %vm400_vm2, %v793_v51  ;;  %v1045_v31 = vrot.slane %v1043_v40, 7  ;;  %v1023_v40 = vrot.slane %v1021_v13, 6  ;;  %v1191_v8 = vrot.slane %v1160_v58, 7  ;;  %v823_v12 = vshrl.u32 %v757_v21, 16 }
 0x13a   :  { %1134 = vrot.lane.b32.xlu2 %v1117_v26, %s2635_s3  ;;  %v1180_v26 = vsel %vm2810_vm7, %v2940_v15, %v1179_v2  ;;  %v801_v2 = vor.u32 %v799_v36, %v798_v44  ;;  %v807_v15 = vrot.slane %v805_v62, 7  ;;  %v819_v3 = vor.u32 %v817_v23, %v816_v1  ;;  %v866_v25 = vld [vmem:[#allocation2 + $0x4] sm:$0xf]  ;;  %v867_v50 = vld [vmem:[#allocation2 + $0x8] sm:$0xf]  ;;  %1470 = vmatpush.bf16.msra.mxu2 %v2545_v47 }
 0x13b   :  { %1212 = vst.msk [vmem:[#allocation3 + $0x14] sm:$0xf] %vm400_vm2, %v1180_v26  ;;  %v1026_v38 = vrot.slane %v1024_v56, 7  ;;  %v3147_v55 = vor.u32 %v1045_v31, %v1042_v48  ;;  %v1190_v0 = vrot.slane %v1188_v7, 4  ;;  %v1161_v13 = vld [vmem:[#allocation2 + $0x20] sm:$0xf] }
 0x13c   :  { %v802_v49 = vsel %vm3053_vm4, %v794_v39, %v801_v2  ;;  %v810_v18 = vor.u32 %v808_v60, %v807_v15  ;;  %v812_v37 = vrot.slane %v807_v15, 4  ;;  %v1010_v34 = vld [vmem:[#allocation2 + $0x10] sm:$0xf]  ;;  %v825_v5 = vrot.slane %v823_v12, 7  ;;  %v2544_v2 = vld [vmem:[%s3526_s4 + $0x20] sm:$0xff] }
 0x13d   :  { %987 = vrot.lane.b32.xlu0 %v3034_v16, %s2636_s12  ;;  %729 = vrot.lane.b32.xlu1 %v712_v29, %s2635_s3  ;;  %860 = vst.msk [vmem:[#allocation3 + $0x28] sm:$0xf] %vm400_vm2, %v802_v49  ;;  %v1189_v16 = vsel %vm2810_vm7, %v1187_v32, %v1188_v7  ;;  %v826_v41 = vshll.u32 %v757_v21, 16  ;;  %v1027_v44 = vor.u32 %v1026_v38, %v1023_v40  ;;  %v3153_v36 = vld [vmem:[#allocation2 + $0x10] sm:$0xf]  ;;  %v1194_v62 = vrot.slane %v1161_v13, 7 }
 0x13e   :  { %v811_v59 = vsel %vm3053_vm4, %v803_v28, %v810_v18  ;;  %v820_v4 = vsel %vm3053_vm4, %v812_v37, %v819_v3  ;;  %1215 = vst.msk [vmem:[#allocation3 + $0x38] sm:$0xf] %vm400_vm2, %v1189_v16  ;;  %v1192_v26 = vsel %vm2810_vm7, %v1190_v0, %v1191_v8  ;;  %v1047_v46 = vsel %vm3028_vm3, %v1038_v27, %v3147_v55  ;;  %v1011_v7 = vld [vmem:[#allocation2 + $0x14] sm:$0xf]  ;;  %v2543_v18 = vld [vmem:[%s3526_s4 + $0x18] sm:$0xff] }
 0x13f   :  { %861 = vst.msk [vmem:[#allocation3 + $0x34] sm:$0xf] %vm400_vm2, %v811_v59  ;;  %v821_v9 = vrot.slane %v816_v1, 4  ;;  %v828_v51 = vor.u32 %v826_v41, %v825_v5  ;;  %v948_v39 = vrot.slane %v922_v33, 6  ;;  %v1050_v45 = vshrl.u32 %v1010_v34, 16  ;;  %1471 = vmatpush.bf16.msra.mxu2 %v2544_v2 }
 0x140   :  { %862 = vst.msk [vmem:[#allocation3 + $0x40] sm:$0xf] %vm400_vm2, %v820_v4  ;;  %v1053_v57 = vshll.u32 %v1010_v34, 16  ;;  %v947_v61 = vrot.slane %v945_v19, 4  ;;  %v1028_v32 = vrot.slane %v1027_v44, 4  ;;  %v951_v29 = vrot.slane %v3153_v36, 6 }
 0x141   :  { %1216 = vst.msk [vmem:[#allocation3 + $0x44] sm:$0xf] %vm400_vm2, %v1192_v26  ;;  %v829_v15 = vsel %vm3053_vm4, %v821_v9, %v828_v51  ;;  %v1060_v28 = vshrl.u32 %v1011_v7, 16  ;;  %v1193_v24 = vrot.slane %v1191_v8, 4  ;;  %v1196_v63 = vrot.slane %v1194_v62, 4  ;;  %v2542_v8 = vld [vmem:[%s3526_s4 + $0x10] sm:$0xff] }
 0x142   :  { %971 = vrot.lane.b32.xlu2 %v946_v43, %s2636_s12  ;;  %863 = vst.msk [vmem:[#allocation3 + $0x4c] sm:$0xf] %vm400_vm2, %v829_v15  ;;  %v1063_v49 = vshll.u32 %v1011_v7, 16  ;;  %v949_v1 = vsel %vm3020_vm1, %v947_v61, %v948_v39  ;;  %v1037_v6 = vsel %vm3028_vm3, %v1028_v32, %v1036_v20  ;;  %v950_v19 = vrot.slane %v948_v39, 4  ;;  %v3180_v43 = vld [vmem:[#allocation2 + $0x24] sm:$0xf] }
 0x143   :  { %v1052_v23 = vrot.slane %v1050_v45, 6  ;;  %v1055_v48 = vrot.slane %v1053_v57, 7  ;;  %v835_v56 = vshll.u32 %v3009_v54, 16  ;;  %v1195_v16 = vsel %vm2810_vm7, %v1193_v24, %v1194_v62  ;;  %1472 = vmatpush.bf16.msra.mxu2 %v2543_v18  ;;  %v868_v38 = vld [vmem:[#allocation2 + $0xc] sm:$0xf]  ;;  %v2540_v26 = vld [vmem:[%s3526_s4] sm:$0xff] }
 0x144   :  { %v1197_v58 = vrot.slane %v3180_v43, 7  ;;  %v952_v31 = vsel %vm3020_vm1, %v950_v19, %v951_v29  ;;  %v1062_v59 = vrot.slane %v1060_v28, 6  ;;  %1217 = vst.msk [vmem:[#allocation3 + $0x50] sm:$0xf] %vm400_vm2, %v1195_v16  ;;  %v1065_v37 = vrot.slane %v1063_v49, 7 }
 0x145   :  { %884 = vrot.lane.b32.xlu0 %v866_v25, %s2637_s13  ;;  %886 = vrot.lane.b32.xlu1 %v867_v50, %s2637_s13  ;;  %v830_v3 = vrot.slane %v825_v5, 4  ;;  %v837_v47 = vor.u32 %v835_v56, %v3042_v30  ;;  %v1056_v20 = vor.u32 %v1055_v48, %v1052_v23  ;;  %v869_v21 = vld [vmem:[#allocation2 + $0x10] sm:$0xf]  ;;  %v2541_v25 = vld [vmem:[%s3526_s4 + $0x8] sm:$0xff]  ;;  %v924_v50 = vld [vmem:[#allocation2 + $0x14] sm:$0xf] }
 0x146   :  { %v1198_v54 = vsel %vm2810_vm7, %v1196_v63, %v1197_v58  ;;  %v1066_v30 = vor.u32 %v1065_v37, %v1062_v59  ;;  %v1012_v12 = vld [vmem:[#allocation2 + $0x18] sm:$0xf]  ;;  %v954_v13 = vrot.slane %v924_v50, 6  ;;  %v1013_v27 = vld [vmem:[#allocation2 + $0x1c] sm:$0xf]  ;;  %v953_v44 = vrot.slane %v951_v29, 4 }
 0x147   :  { %1218 = vst.msk [vmem:[#allocation3 + $0x5c] sm:$0xf] %vm400_vm2, %v1198_v54  ;;  %v838_v40 = vsel %vm3053_vm4, %v830_v3, %v837_v47  ;;  %1473 = vmatpush.bf16.msra.mxu2 %v2542_v8  ;;  %v1058_v52 = vrot.slane %v1056_v20, 4  ;;  %v925_v33 = vld [vmem:[#allocation2 + $0x18] sm:$0xf]  ;;  %v1070_v34 = vshrl.u32 %v1012_v12, 16 }
 0x148   :  { %864 = vst.msk [vmem:[#allocation3 + $0x58] sm:$0xf] %vm400_vm2, %v838_v40  ;;  %v1073_v5 = vshll.u32 %v1012_v12, 16  ;;  %v1048_v36 = vrot.slane %v3147_v55, 4  ;;  %v957_v62 = vrot.slane %v925_v33, 6  ;;  %v1083_v7 = vshll.u32 %v1013_v27, 16 }
 0x149   :  { %v1067_v0 = vsel %vm3028_vm3, %v1058_v52, %v1066_v30  ;;  %v955_v9 = vsel %vm3020_vm1, %v953_v44, %v954_v13  ;;  %v956_v39 = vrot.slane %v954_v13, 4  ;;  %v1072_v55 = vrot.slane %v1070_v34, 6  ;;  %v870_v24 = vld [vmem:[#allocation2 + $0x14] sm:$0xf]  ;;  %v871_v63 = vld [vmem:[#allocation2 + $0x18] sm:$0xf] }
 0x14a   :  { %1120 = vrot.lane.b32.xlu2 %v1047_v46, %s2635_s3  ;;  %v1080_v46 = vshrl.u32 %v1013_v27, 16  ;;  %v1057_v51 = vsel %vm3028_vm3, %v1048_v36, %v1056_v20  ;;  %v1075_v45 = vrot.slane %v1073_v5, 7  ;;  %v1085_v15 = vrot.slane %v1083_v7, 7  ;;  %v926_v18 = vld [vmem:[#allocation2 + $0x1c] sm:$0xf]  ;;  %v2554_v33 = vld [vmem:[%s3526_s4 + $0x70] sm:$0xff] }
 0x14b   :  { %v3167_v60 = vpop.permute.xlu2 %713  ;;  %1474 = vmatpush.bf16.msra.mxu2 %v2541_v25  ;;  %v958_v57 = vsel %vm3020_vm1, %v956_v39, %v957_v62  ;;  %v960_v19 = vrot.slane %v926_v18, 6  ;;  %v959_v23 = vrot.slane %v957_v62, 4  ;;  %v1068_v48 = vrot.slane %v1066_v30, 4  ;;  %v872_v47 = vld [vmem:[#allocation2 + $0x1c] sm:$0xf]  ;;  %v2553_v27 = vld [vmem:[%s3526_s4 + $0x68] sm:$0xff] }
 0x14c   :  { %v1082_v2 = vrot.slane %v1080_v46, 6  ;;  %v1076_v61 = vor.u32 %v1075_v45, %v1072_v55  ;;  %v873_v54 = vld [vmem:[#allocation2 + $0x20] sm:$0xf]  ;;  %v2555_v12 = vld [vmem:[%s3526_s4 + $0x78] sm:$0xff]  ;;  %v2557_v7 = vld [vmem:[%s3526_s4 + $0x88] sm:$0xff]  ;;  %vm1452_vm9 = vcmask 261120  }
 0x14d   :  { %973 = vrot.lane.b32.xlu0 %v949_v1, %s2636_s12  ;;  %1118 = vrot.lane.b32.xlu1 %v1037_v6, %s2635_s3  ;;  %v961_v56 = vsel %vm3020_vm1, %v959_v23, %v960_v19  ;;  %v962_v59 = vrot.slane %v960_v19, 4  ;;  %v2552_v62 = vld [vmem:[%s3526_s4 + $0x60] sm:$0xff]  ;;  %v2551_v46 = vld [vmem:[%s3526_s4 + $0x58] sm:$0xff] }
 0x14e   :  { %v1086_v29 = vor.u32 %v1085_v15, %v1082_v2  ;;  %v1078_v49 = vrot.slane %v1076_v61, 4  ;;  %v1077_v16 = vsel %vm3028_vm3, %v1068_v48, %v1076_v61  ;;  %1501 = vmatpush.bf16.msra.mxu3 %v2555_v12  ;;  %v2550_v55 = vld [vmem:[%s3526_s4 + $0x50] sm:$0xff]  ;;  %v2549_v45 = vld [vmem:[%s3526_s4 + $0x48] sm:$0xff] }
 0x14f   :  { %1475 = vmatpush.bf16.msra.mxu2 %v2540_v26 }
 0x150   :  { %v1087_v6 = vsel %vm3028_vm3, %v1078_v49, %v1086_v29  ;;  %v1088_v8 = vrot.slane %v1086_v29, 4 }
 0x152   :  { %975 = vrot.lane.b32.xlu2 %v952_v31, %s2636_s12  ;;  %v1097_v30 = vsel %vm3028_vm3, %v1088_v8, %v3044_v35  ;;  %1502 = vmatpush.bf16.msra.mxu3 %v2554_v33 }
 0x153   :  { %v3200_v4 = vpop.permute.xlu2 %715  ;;  %1540 = vmatpush.bf16.msrb.mxu2 %v2557_v7 }
 0x155   :  { %888 = vrot.lane.b32.xlu0 %v868_v38, %s2637_s13  ;;  %890 = vrot.lane.b32.xlu1 %v869_v21, %s2637_s13 }
 0x156   :  { %1503 = vmatpush.bf16.msra.mxu3 %v2553_v27 }
 0x15a   :  { %1124 = vrot.lane.b32.xlu2 %v1067_v0, %s2635_s3  ;;  %1504 = vmatpush.bf16.msra.mxu3 %v2552_v62 }
 0x15c   :  { %v3214_v41 = vpop.permute.xlu2 %629 }
 0x15d   :  { %977 = vrot.lane.b32.xlu0 %v955_v9, %s2636_s12  ;;  %1122 = vrot.lane.b32.xlu1 %v1057_v51, %s2635_s3 }
 0x15e   :  { %1505 = vmatpush.bf16.msra.mxu3 %v2551_v46 }
 0x162   :  { %979 = vrot.lane.b32.xlu2 %v958_v57, %s2636_s12  ;;  %1506 = vmatpush.bf16.msra.mxu3 %v2550_v55 }
 0x164   :  { %v626_v32 = vpop.permute.xlu1 %625  ;;  %v720_v28 = vpop.permute.xlu2 %719 }
 0x165   :  { %892 = vrot.lane.b32.xlu0 %v870_v24, %s2637_s13  ;;  %894 = vrot.lane.b32.xlu1 %v871_v63, %s2637_s13  ;;  %v2556_v24 = vld [vmem:[%s3526_s4 + $0x80] sm:$0xff] }
 0x166   :  { %1507 = vmatpush.bf16.msra.mxu3 %v2549_v45  ;;  %1541 = vmatpush.bf16.msrb.mxu2 %v2556_v24  ;;  %v2260_v45 = vld [vmem:[#allocation3 + $0x50] sm:$0xf] }
 0x167   :  { %v538_v1 = vpop.permute.xlu0 %537 }
 0x168   :  { %565 = vst.msk [vmem:[#allocation3] sm:$0xf] %vm564_vm5, %v538_v1 }
 0x169   :  { %653 = vst.msk [vmem:[#allocation3] sm:$0xf] %vm652_vm6, %v626_v32 }
 0x16a   :  { %1128 = vrot.lane.b32.xlu2 %v1087_v6, %s2635_s3  ;;  %741 = vst.msk [vmem:[#allocation3] sm:$0xf] %vm740_vm8, %v3167_v60  ;;  %v964_v60 = vsel %vm3020_vm1, %v962_v59, %v963_v53 }
 0x16c   :  { %v628_v31 = vpop.permute.xlu1 %627  ;;  %v634_v37 = vpop.permute.xlu2 %633 }
 0x16d   :  { %981 = vrot.lane.b32.xlu0 %v961_v56, %s2636_s12  ;;  %1126 = vrot.lane.b32.xlu1 %v1077_v16, %s2635_s3 }
 0x16f   :  { %v540_v3 = vpop.permute.xlu0 %539 }
 0x170   :  { %566 = vst.msk [vmem:[#allocation3 + $0xc] sm:$0xf] %vm564_vm5, %v540_v3 }
 0x171   :  { %654 = vst.msk [vmem:[#allocation3 + $0xc] sm:$0xf] %vm652_vm6, %v628_v31  ;;  %v2216_v53 = vld [vmem:[#allocation3] sm:$0xf] }
 0x172   :  { %983 = vrot.lane.b32.xlu2 %v964_v60, %s2636_s12  ;;  %742 = vst.msk [vmem:[#allocation3 + $0xc] sm:$0xf] %vm740_vm8, %v3200_v4 }
 0x174   :  { %v718_v20 = vpop.permute.xlu1 %717  ;;  %v724_v40 = vpop.permute.xlu2 %723 }
 0x175   :  { %896 = vrot.lane.b32.xlu0 %v872_v47, %s2637_s13  ;;  %898 = vrot.lane.b32.xlu1 %v873_v54, %s2637_s13  ;;  %v2530_v54 = vld [vmem:[#allocation3 + $0x10] sm:$0xf0]  ;;  %s2639_s13 = smov [#allocation5]  }
 0x176   :  { %s2104_s14 = sshll.u32 %s2639_s13, 4  ;;  %s2105_s14 = int_to_ptr.vmem [resolvable:$true] %s2104_s14 }
 0x177   :  { %v542_v42 = vpop.permute.xlu0 %541 }
 0x178   :  { %567 = vst.msk [vmem:[#allocation3 + $0x18] sm:$0xf] %vm564_vm5, %v542_v42  ;;  %v2224_v42 = vld [vmem:[#allocation3 + $0x8] sm:$0xf] }
 0x179   :  { %655 = vst.msk [vmem:[#allocation3 + $0x18] sm:$0xf] %vm652_vm6, %v3214_v41  ;;  %v2529_v10 = vld [vmem:[#allocation3 + $0x8] sm:$0xf0] }
 0x17a   :  { %1132 = vrot.lane.b32.xlu2 %v3065_v17, %s2635_s3  ;;  %743 = vst.msk [vmem:[#allocation3 + $0x18] sm:$0xf] %vm740_vm8, %v718_v20  ;;  %v2217_v4 = vor.u32 %v2529_v10, %v2216_v53 }
 0x17c   :  { %1476 = vmatmul.bf16.vlgmr.msra.gmra.mxu2 %v2217_v4  ;;  %v638_v21 = vpop.permute.xlu2 %637 }
 0x17d   :  { %985 = vrot.lane.b32.xlu0 %v3038_v22, %s2636_s12  ;;  %1130 = vrot.lane.b32.xlu1 %v1097_v30, %s2635_s3 }
 0x17f   :  { %v632_v17 = vpop.permute.xlu0 %631  ;;  %v544_v38 = vpop.permute.xlu1 %543 }
 0x180   :  { %568 = vst.msk [vmem:[#allocation3 + $0x24] sm:$0xf] %vm564_vm5, %v544_v38 }
 0x181   :  { %656 = vst.msk [vmem:[#allocation3 + $0x24] sm:$0xf] %vm652_vm6, %v632_v17  ;;  %v2228_v14 = vld [vmem:[#allocation3 + $0x18] sm:$0xf] }
 0x182   :  { %744 = vst.msk [vmem:[#allocation3 + $0x24] sm:$0xf] %vm740_vm8, %v720_v28  ;;  %v2548_v28 = vld [vmem:[%s3526_s4 + $0x40] sm:$0xff] }
 0x183   :  { %1508 = vmatpush.bf16.msra.mxu3 %v2548_v28 }
 0x184   :  { %v728_v50 = vpop.permute.xlu2 %727 }
 0x187   :  { %v722_v25 = vpop.permute.xlu1 %721  ;;  %v546_v52 = vpop.permute.xlu0 %545 }
 0x188   :  { %569 = vst.msk [vmem:[#allocation3 + $0x30] sm:$0xf] %vm564_vm5, %v546_v52  ;;  %v2236_v52 = vld [vmem:[#allocation3 + $0x20] sm:$0xf] }
 0x189   :  { %657 = vst.msk [vmem:[#allocation3 + $0x30] sm:$0xf] %vm652_vm6, %v634_v37  ;;  %v2532_v35 = vld [vmem:[#allocation3 + $0x20] sm:$0xf0] }
 0x18a   :  { %745 = vst.msk [vmem:[#allocation3 + $0x30] sm:$0xf] %vm740_vm8, %v722_v25  ;;  %v2229_v22 = vor.u32 %v2532_v35, %v2228_v14 }
 0x18c   :  { %1481 = vmatmul.bf16.gmra.mxu2 %v2229_v22  ;;  %v642_v34 = vpop.permute.xlu2 %641 }
 0x18f   :  { %v636_v0 = vpop.permute.xlu0 %635  ;;  %v548_v13 = vpop.permute.xlu1 %547 }
 0x190   :  { %570 = vst.msk [vmem:[#allocation3 + $0x3c] sm:$0xf] %vm564_vm5, %v548_v13 }
 0x191   :  { %658 = vst.msk [vmem:[#allocation3 + $0x3c] sm:$0xf] %vm652_vm6, %v636_v0  ;;  %v2240_v44 = vld [vmem:[#allocation3 + $0x30] sm:$0xf] }
 0x192   :  { %746 = vst.msk [vmem:[#allocation3 + $0x3c] sm:$0xf] %vm740_vm8, %v724_v40  ;;  %v2225_v40 = vor.u32 %v2530_v54, %v2224_v42 }
 0x194   :  { %v1135_v39 = vpop.permute.xlu2 %1134 }
 0x197   :  { %v726_v5 = vpop.permute.xlu1 %725  ;;  %v550_v41 = vpop.permute.xlu0 %549 }
 0x198   :  { %571 = vst.msk [vmem:[#allocation3 + $0x48] sm:$0xf] %vm564_vm5, %v550_v41  ;;  %v2248_v41 = vld [vmem:[#allocation3 + $0x38] sm:$0xf] }
 0x199   :  { %659 = vst.msk [vmem:[#allocation3 + $0x48] sm:$0xf] %vm652_vm6, %v638_v21  ;;  %v2535_v36 = vld [vmem:[#allocation3 + $0x38] sm:$0xf0]  ;;  %v2533_v21 = vld [vmem:[#allocation3 + $0x28] sm:$0xf0] }
 0x19a   :  { %747 = vst.msk [vmem:[#allocation3 + $0x48] sm:$0xf] %vm740_vm8, %v726_v5  ;;  %v2241_v26 = vor.u32 %v2535_v36, %v2240_v44  ;;  %v2237_v35 = vor.u32 %v2533_v21, %v2236_v52  ;;  %v1163_v36 = vld [vmem:[#allocation2 + $0x28] sm:$0x7] }
 0x19b   :  { %v1200_v62 = vrot.slane %v1163_v36, 7 }
 0x19c   :  { %1486 = vmatmul.bf16.gmra.mxu2 %v2241_v26  ;;  %v972_v32 = vpop.permute.xlu2 %971  ;;  %v1199_v26 = vrot.slane %v1197_v58, 4  ;;  %v2539_v58 = vld [vmem:[#allocation3 + $0x58] sm:$0xf0] }
 0x19f   :  { %v640_v9 = vpop.permute.xlu0 %639  ;;  %v552_v51 = vpop.permute.xlu1 %551 }
 0x1a0   :  { %572 = vst.msk [vmem:[#allocation3 + $0x54] sm:$0xf] %vm564_vm5, %v552_v51  ;;  %v1201_v51 = vsel %vm2810_vm7, %v1199_v26, %v1200_v62  ;;  %v3371_v26 = vld [vmem:[%s3527_s5] ss:$0 sm:$0xff] }
 0x1a1   :  { %660 = vst.msk [vmem:[#allocation3 + $0x54] sm:$0xf] %vm652_vm6, %v640_v9  ;;  %v2252_v15 = vld [vmem:[#allocation3 + $0x48] sm:$0xf] }
 0x1a2   :  { %748 = vst.msk [vmem:[#allocation3 + $0x54] sm:$0xf] %vm740_vm8, %v728_v50 }
 0x1a3   :  { %1219 = vst.msk [vmem:[#allocation3 + $0x68] sm:$0xf] %vm400_vm2, %v1201_v51  ;;  %vm1670_vm2 = vcmask 523264  }
 0x1a4   :  { %v1121_v18 = vpop.permute.xlu2 %1120 }
 0x1a7   :  { %v554_v57 = vpop.permute.xlu0 %553  ;;  %v901_v2 = vpop.permute.xlu1 %900 }
 0x1a8   :  { %573 = vst.msk [vmem:[#allocation3 + $0x60] sm:$0xf] %vm564_vm5, %v554_v57  ;;  %v2261_v57 = vor.u32 %v2539_v58, %v2260_v45 }
 0x1a9   :  { %661 = vst.msk [vmem:[#allocation3 + $0x60] sm:$0xf] %vm652_vm6, %v642_v34  ;;  %v2538_v61 = vld [vmem:[#allocation3 + $0x50] sm:$0xf0]  ;;  %v2536_v34 = vld [vmem:[#allocation3 + $0x40] sm:$0xf0] }
 0x1aa   :  { %919 = vst.msk [vmem:[#allocation3 + $0x64] sm:$0xf] %vm564_vm5, %v901_v2  ;;  %v2253_v29 = vor.u32 %v2538_v61, %v2252_v15  ;;  %v2249_v44 = vor.u32 %v2536_v34, %v2248_v41  ;;  %v1237_v15 = vld [vmem:[#allocation3 + $0x68] sm:$0xf] }
 0x1ab   :  { %v1318_v61 = vunpack.c.l.b16 %v1237_v15 }
 0x1ac   :  { %1491 = vmatmul.bf16.gmra.mxu2 %v2253_v29  ;;  %v976_v56 = vpop.permute.xlu2 %975 }
 0x1ad   :  { %v1333_v28 = vpack.c.b16 %v1318_v61, %v1318_v61 }
 0x1af   :  { %v988_v63 = vpop.permute.xlu0 %987  ;;  %v730_v49 = vpop.permute.xlu1 %729 }
 0x1b0   :  { %1006 = vst.msk [vmem:[#allocation3 + $0x64] sm:$0xf] %vm652_vm6, %v988_v63 }
 0x1b1   :  { %1153 = vst.msk [vmem:[#allocation3 + $0x64] sm:$0xf] %vm740_vm8, %v1135_v39 }
 0x1b2   :  { %749 = vst.msk [vmem:[#allocation3 + $0x60] sm:$0xf] %vm740_vm8, %v730_v49 }
 0x1b4   :  { %v1125_v3 = vpop.permute.xlu2 %1124 }
 0x1b7   :  { %v885_v1 = vpop.permute.xlu0 %884  ;;  %v887_v6 = vpop.permute.xlu1 %886 }
 0x1b8   :  { %911 = vst.msk [vmem:[#allocation3 + $0x4] sm:$0xf] %vm564_vm5, %v885_v1 }
 0x1b9   :  { %998 = vst.msk [vmem:[#allocation3 + $0x4] sm:$0xf] %vm652_vm6, %v972_v32  ;;  %v3320_v19 = vld [vmem:[#allocation3 + $0x60] sm:$0xff] }
 0x1ba   :  { %912 = vst.msk [vmem:[#allocation3 + $0x10] sm:$0xf] %vm564_vm5, %v887_v6  ;;  %v1316_v23 = vunpack.c.l.b16 %v3320_v19  ;;  %v1317_v11 = vunpack.c.h.b16 %v3320_v19 }
 0x1bc   :  { %v1331_v48 = vpack.c.b16 %v1316_v23, %v1316_v23  ;;  %v980_v4 = vpop.permute.xlu2 %979  ;;  %v1332_v29 = vpack.c.b16 %v1317_v11, %v1317_v11 }
 0x1be   :  { %1496 = vmatmul.bf16.gmra.mxu2 %v1331_v48 }
 0x1bf   :  { %v974_v16 = vpop.permute.xlu0 %973  ;;  %v1119_v31 = vpop.permute.xlu1 %1118 }
 0x1c0   :  { %999 = vst.msk [vmem:[#allocation3 + $0x10] sm:$0xf] %vm652_vm6, %v974_v16 }
 0x1c1   :  { %1146 = vst.msk [vmem:[#allocation3 + $0x10] sm:$0xf] %vm740_vm8, %v1121_v18 }
 0x1c2   :  { %1145 = vst.msk [vmem:[#allocation3 + $0x4] sm:$0xf] %vm740_vm8, %v1119_v31 }
 0x1c4   :  { %v1129_v14 = vpop.permute.xlu2 %1128 }
 0x1c7   :  { %v889_v59 = vpop.permute.xlu0 %888  ;;  %v891_v37 = vpop.permute.xlu1 %890 }
 0x1c8   :  { %913 = vst.msk [vmem:[#allocation3 + $0x1c] sm:$0xf] %vm564_vm5, %v889_v59  ;;  %v2218_v60 = vld [vmem:[#allocation3 + $0xc] sm:$0xf0] }
 0x1c9   :  { %1000 = vst.msk [vmem:[#allocation3 + $0x1c] sm:$0xf] %vm652_vm6, %v976_v56  ;;  %v2528_v47 = vld [vmem:[#allocation3 + $0x4] sm:$0xf] }
 0x1ca   :  { %914 = vst.msk [vmem:[#allocation3 + $0x28] sm:$0xf] %vm564_vm5, %v891_v37  ;;  %v2221_v20 = vor.u32 %v2528_v47, %v2218_v60 }
 0x1cc   :  { %1509 = vmatmul.bf16.vlgmr.msra.gmra.mxu3 %v2221_v20  ;;  %v984_v12 = vpop.permute.xlu2 %983 }
 0x1ce   :  { %2334 = vmatmul.msk.bf16.vlgmr.msrb.gmra.mxu2 %vm1452_vm9, %v2225_v40 }
 0x1cf   :  { %v978_v53 = vpop.permute.xlu0 %977  ;;  %v1123_v10 = vpop.permute.xlu1 %1122 }
 0x1d0   :  { %1001 = vst.msk [vmem:[#allocation3 + $0x28] sm:$0xf] %vm652_vm6, %v978_v53 }
 0x1d1   :  { %1148 = vst.msk [vmem:[#allocation3 + $0x28] sm:$0xf] %vm740_vm8, %v1125_v3 }
 0x1d2   :  { %1147 = vst.msk [vmem:[#allocation3 + $0x1c] sm:$0xf] %vm740_vm8, %v1123_v10 }
 0x1d4   :  { %v1133_v9 = vpop.permute.xlu2 %1132 }
 0x1d7   :  { %v893_v8 = vpop.permute.xlu0 %892  ;;  %v895_v30 = vpop.permute.xlu1 %894 }
 0x1d8   :  { %915 = vst.msk [vmem:[#allocation3 + $0x34] sm:$0xf] %vm564_vm5, %v893_v8  ;;  %v2230_v17 = vld [vmem:[#allocation3 + $0x24] sm:$0xf0] }
 0x1d9   :  { %1002 = vst.msk [vmem:[#allocation3 + $0x34] sm:$0xf] %vm652_vm6, %v980_v4  ;;  %v2531_v38 = vld [vmem:[#allocation3 + $0x1c] sm:$0xf] }
 0x1da   :  { %916 = vst.msk [vmem:[#allocation3 + $0x40] sm:$0xf] %vm564_vm5, %v895_v30  ;;  %v2233_v25 = vor.u32 %v2531_v38, %v2230_v17 }
 0x1dc   :  { %1514 = vmatmul.bf16.gmra.mxu3 %v2233_v25 }
 0x1de   :  { %2335 = vmatmul.msk.bf16.gmra.mxu2 %vm1452_vm9, %v2237_v35 }
 0x1df   :  { %v982_v22 = vpop.permute.xlu0 %981  ;;  %v1127_v50 = vpop.permute.xlu1 %1126 }
 0x1e0   :  { %1003 = vst.msk [vmem:[#allocation3 + $0x40] sm:$0xf] %vm652_vm6, %v982_v22 }
 0x1e1   :  { %1150 = vst.msk [vmem:[#allocation3 + $0x40] sm:$0xf] %vm740_vm8, %v1129_v14 }
 0x1e2   :  { %1149 = vst.msk [vmem:[#allocation3 + $0x34] sm:$0xf] %vm740_vm8, %v1127_v50 }
 0x1e7   :  { %v897_v0 = vpop.permute.xlu0 %896  ;;  %v899_v13 = vpop.permute.xlu1 %898 }
 0x1e8   :  { %917 = vst.msk [vmem:[#allocation3 + $0x4c] sm:$0xf] %vm564_vm5, %v897_v0  ;;  %v2242_v33 = vld [vmem:[#allocation3 + $0x3c] sm:$0xf0] }
 0x1e9   :  { %1004 = vst.msk [vmem:[#allocation3 + $0x4c] sm:$0xf] %vm652_vm6, %v984_v12  ;;  %v2534_v27 = vld [vmem:[#allocation3 + $0x34] sm:$0xf] }
 0x1ea   :  { %918 = vst.msk [vmem:[#allocation3 + $0x58] sm:$0xf] %vm564_vm5, %v899_v13  ;;  %v2245_v5 = vor.u32 %v2534_v27, %v2242_v33 }
 0x1ec   :  { %1519 = vmatmul.bf16.gmra.mxu3 %v2245_v5 }
 0x1ee   :  { %2336 = vmatmul.msk.bf16.gmra.mxu2 %vm1452_vm9, %v2249_v44 }
 0x1ef   :  { %v986_v46 = vpop.permute.xlu0 %985  ;;  %v1131_v7 = vpop.permute.xlu1 %1130 }
 0x1f0   :  { %1005 = vst.msk [vmem:[#allocation3 + $0x58] sm:$0xf] %vm652_vm6, %v986_v46 }
 0x1f1   :  { %1152 = vst.msk [vmem:[#allocation3 + $0x58] sm:$0xf] %vm740_vm8, %v1133_v9 }
 0x1f2   :  { %1151 = vst.msk [vmem:[#allocation3 + $0x4c] sm:$0xf] %vm740_vm8, %v1131_v7 }
 0x1f8   :  { %v2254_v39 = vld [vmem:[#allocation3 + $0x54] sm:$0xf0] }
 0x1f9   :  { %v2537_v43 = vld [vmem:[#allocation3 + $0x4c] sm:$0xf] }
 0x1fa   :  { %v2257_v55 = vor.u32 %v2537_v43, %v2254_v39 }
 0x1fc   :  { %1524 = vmatmul.bf16.gmra.mxu3 %v2257_v55 }
 0x1fe   :  { %2337 = vmatmul.msk.bf16.gmra.mxu2 %vm1452_vm9, %v2261_v57 }
 0x1ff   :  { %v1477_v2 = vpop.f32.mrf.mxu2 }
 0x207   :  { %v1479_v32 = vpop.f32.mrf.mxu2 }
 0x20c   :  { %1529 = vmatmul.bf16.gmra.mxu3 %v1332_v29 }
 0x20e   :  { %2338 = vmatmul.msk.bf16.gmra.mxu2 %vm1452_vm9, %v1333_v28 }
 0x20f   :  { %v1482_v24 = vpop.f32.mrf.mxu2 }
 0x217   :  { %v1484_v63 = vpop.f32.mrf.mxu2 }
 0x21f   :  { %v1487_v49 = vpop.f32.mrf.mxu2 }
 0x227   :  { %v1489_v18 = vpop.f32.mrf.mxu2 }
 0x22f   :  { %v1492_v1 = vpop.f32.mrf.mxu2 }
 0x237   :  { %v1494_v6 = vpop.f32.mrf.mxu2 }
 0x241   :  { %v1497_v23 = vpop.f32.mrf.mxu2 }
 0x249   :  { %v1499_v48 = vpop.f32.mrf.mxu2 }
 0x24f   :  { %v1510_v56 = vpop.f32.mrf.mxu3 }
 0x250   :  { %v1511_v16 = vadd.f32 %v1510_v56, %v1477_v2 }
 0x251   :  { %v1543_v31 = vpop.f32.mrf.mxu2 }
 0x252   :  { %v1544_v59 = vadd.f32 %v1543_v31, %v1511_v16 }
 0x254   :  { %1567 = vst [vmem:[#allocation4] sm:$0xff] %v1544_v59 }
 0x257   :  { %v1512_v19 = vpop.f32.mrf.mxu3 }
 0x258   :  { %v1513_v37 = vadd.f32 %v1512_v19, %v1479_v32 }
 0x259   :  { %v1545_v3 = vpop.f32.mrf.mxu2 }
 0x25a   :  { %v1546_v60 = vadd.f32 %v1545_v3, %v1513_v37 }
 0x25c   :  { %1568 = vst [vmem:[#allocation4 + $0x8] sm:$0xff] %v1546_v60 }
 0x25f   :  { %v1515_v47 = vpop.f32.mrf.mxu3 }
 0x260   :  { %v1516_v54 = vadd.f32 %v1515_v47, %v1482_v24 }
 0x261   :  { %v1548_v20 = vpop.f32.mrf.mxu2 }
 0x262   :  { %v3356_v42 = vadd.f32 %v1548_v20, %v1516_v54 }
 0x263   :  { %v1584_v0 = vld [vmem:[#allocation4 + $0x1] sm:$0xff] }
 0x264   :  { %1569 = vst [vmem:[#allocation4 + $0x10] sm:$0xff] %v3356_v42  ;;  %v1600_v13 = vld [vmem:[#allocation4 + $0x6] sm:$0xff]  ;;  %v1592_v5 = vmax.f32 %v1544_v59, %v1584_v0 }
 0x265   :  { %v1608_v33 = vld [vmem:[#allocation4 + $0x7] sm:$0xff] }
 0x266   :  { %v1616_v41 = vmax.f32 %v1600_v13, %v1608_v33 }
 0x267   :  { %v1517_v40 = vpop.f32.mrf.mxu3 }
 0x268   :  { %v1518_v53 = vadd.f32 %v1517_v40, %v1484_v63  ;;  %v1624_v62 = vmax.f32 %v1592_v5, %v1616_v41 }
 0x269   :  { %v1550_v10 = vpop.f32.mrf.mxu2 }
 0x26a   :  { %v3359_v4 = vadd.f32 %v1550_v10, %v1518_v53  ;;  %v1636_v45 = vadd.f32 %v3371_v26, %v1624_v62 }
 0x26b   :  { %v1585_v46 = vld [vmem:[#allocation4 + $0x9] sm:$0xff] }
 0x26c   :  { %1570 = vst [vmem:[#allocation4 + $0x18] sm:$0xff] %v3359_v4  ;;  %v1601_v7 = vld [vmem:[#allocation4 + $0xe] sm:$0xff]  ;;  %v1593_v51 = vmax.f32 %v1546_v60, %v1585_v46  ;;  %v1644_v29 = vmax.f32 %v1636_v45, 0.0  ;;  %v2567_v46 = vld [vmem:[%s3528_s6 + $0x38] sm:$0xff] }
 0x26d   :  { %v1609_v9 = vld [vmem:[#allocation4 + $0xf] sm:$0xff]  ;;  %1841 = vmatpush.bf16.msrb.mxu0 %v2567_v46  ;;  %v2607_v46 = vld [vmem:[%s3529_s7] ss:$0 sm:$0xff] }
 0x26e   :  { %v1617_v39 = vmax.f32 %v1601_v7, %v1609_v9  ;;  %v2581_v45 = vld [vmem:[%s3528_s6 + $0xa8] sm:$0xff] }
 0x26f   :  { %v1520_v8 = vpop.f32.mrf.mxu3 }
 0x270   :  { %v1521_v30 = vadd.f32 %v1520_v8, %v1487_v49  ;;  %v1625_v55 = vmax.f32 %v1593_v51, %v1617_v39  ;;  %v2566_v51 = vld [vmem:[%s3528_s6 + $0x30] sm:$0xff] }
 0x271   :  { %v1553_v17 = vpop.f32.mrf.mxu2  ;;  %v2582_v39 = vld [vmem:[%s3528_s6 + $0xb0] sm:$0xff]  ;;  %1842 = vmatpush.bf16.msrb.mxu0 %v2566_v51 }
 0x272   :  { %v3362_v38 = vadd.f32 %v1553_v17, %v1521_v30  ;;  %v1637_v15 = vadd.f32 %v3371_v26, %v1625_v55 }
 0x273   :  { %v1586_v40 = vld [vmem:[#allocation4 + $0x11] sm:$0xff] }
 0x274   :  { %1571 = vst [vmem:[#allocation4 + $0x20] sm:$0xff] %v3362_v38  ;;  %v1645_v28 = vmax.f32 %v1637_v15, 0.0  ;;  %v1602_v53 = vld [vmem:[#allocation4 + $0x16] sm:$0xff]  ;;  %v2564_v15 = vld [vmem:[%s3528_s6 + $0x20] sm:$0xff] }
 0x275   :  { %v1610_v10 = vld [vmem:[#allocation4 + $0x17] sm:$0xff] }
 0x276   :  { %v1652_v56 = vpack.c.bf16 %v1645_v28, %v1644_v29  ;;  %v1618_v0 = vmax.f32 %v1602_v53, %v1610_v10  ;;  %v2563_v29 = vld [vmem:[%s3528_s6 + $0x18] sm:$0xff]  ;;  %v2576_v53 = vld [vmem:[%s3528_s6 + $0x80] sm:$0xff] }
 0x277   :  { %v1522_v21 = vpop.f32.mrf.mxu3  ;;  %v2579_v28 = vld [vmem:[%s3528_s6 + $0x98] sm:$0xff] }
 0x278   :  { %v1523_v25 = vadd.f32 %v1522_v21, %v1489_v18  ;;  %v2599_v10 = vld [vmem:[%s3530_s8 + $0x38] sm:$0xff] }
 0x279   :  { %v1555_v52 = vpop.f32.mrf.mxu2 }
 0x27a   :  { %v3365_v14 = vadd.f32 %v1555_v52, %v1523_v25 }
 0x27b   :  { %v1587_v19 = vld [vmem:[#allocation4 + $0x19] sm:$0xff] }
 0x27c   :  { %1572 = vst [vmem:[#allocation4 + $0x28] sm:$0xff] %v3365_v14  ;;  %v1603_v47 = vld [vmem:[#allocation4 + $0x1e] sm:$0xff]  ;;  %v1595_v21 = vmax.f32 %v3359_v4, %v1587_v19 }
 0x27d   :  { %v1611_v54 = vld [vmem:[#allocation4 + $0x1f] sm:$0xff] }
 0x27e   :  { %v2578_v19 = vld [vmem:[%s3528_s6 + $0x90] sm:$0xff] }
 0x27f   :  { %v1525_v35 = vpop.f32.mrf.mxu3 }
 0x280   :  { %v1526_v22 = vadd.f32 %v1525_v35, %v1492_v1  ;;  %v1619_v35 = vmax.f32 %v1603_v47, %v1611_v54  ;;  %v2585_v47 = vld [vmem:[%s3528_s6 + $0xc8] sm:$0xff] }
 0x281   :  { %v1558_v50 = vpop.f32.mrf.mxu2  ;;  %v2577_v54 = vld [vmem:[%s3528_s6 + $0x88] sm:$0xff] }
 0x282   :  { %v1559_v12 = vadd.f32 %v1558_v50, %v1526_v22 }
 0x283   :  { %v1612_v48 = vld [vmem:[#allocation4 + $0x27] sm:$0xff] }
 0x284   :  { %1573 = vst [vmem:[#allocation4 + $0x30] sm:$0xff] %v1559_v12 }
 0x287   :  { %v1527_v27 = vpop.f32.mrf.mxu3 }
 0x288   :  { %v1528_v34 = vadd.f32 %v1527_v27, %v1494_v6  ;;  %v1588_v6 = vld [vmem:[#allocation4 + $0x21] sm:$0xff]  ;;  %v1627_v27 = vmax.f32 %v1595_v21, %v1619_v35 }
 0x289   :  { %v1560_v44 = vpop.f32.mrf.mxu2  ;;  %v1596_v3 = vmax.f32 %v3362_v38, %v1588_v6  ;;  %v2569_v6 = vld [vmem:[%s3528_s6 + $0x48] sm:$0xff] }
 0x28a   :  { %v1561_v36 = vadd.f32 %v1560_v44, %v1528_v34  ;;  %v1639_v62 = vadd.f32 %v3371_v26, %v1627_v27  ;;  %v2592_v27 = vld [vmem:[%s3530_s8] sm:$0xff] }
 0x28b   :  { %v1589_v24 = vld [vmem:[#allocation4 + $0x29] sm:$0xff] }
 0x28c   :  { %1574 = vst [vmem:[#allocation4 + $0x38] sm:$0xff] %v1561_v36  ;;  %v1605_v63 = vld [vmem:[#allocation4 + $0x2e] sm:$0xff]  ;;  %v1597_v31 = vmax.f32 %v3365_v14, %v1589_v24 }
 0x28d   :  { %v1613_v49 = vld [vmem:[#allocation4 + $0x2f] sm:$0xff] }
 0x28e   :  { %v1621_v59 = vmax.f32 %v1605_v63, %v1613_v49  ;;  %v2573_v24 = vld [vmem:[%s3528_s6 + $0x68] sm:$0xff]  ;;  %v2572_v63 = vld [vmem:[%s3528_s6 + $0x60] sm:$0xff]  ;;  %v2571_v49 = vld [vmem:[%s3528_s6 + $0x58] sm:$0xff] }
 0x28f   :  { %v1530_v43 = vpop.f32.mrf.mxu3 }
 0x290   :  { %v1531_v58 = vadd.f32 %v1530_v43, %v1497_v23  ;;  %v1604_v23 = vld [vmem:[#allocation4 + $0x26] sm:$0xff]  ;;  %v1629_v14 = vmax.f32 %v1597_v31, %v1621_v59  ;;  %v2562_v59 = vld [vmem:[%s3528_s6 + $0x10] sm:$0xff] }
 0x291   :  { %v1563_v57 = vpop.f32.mrf.mxu2  ;;  %v1620_v60 = vmax.f32 %v1604_v23, %v1612_v48  ;;  %v2568_v23 = vld [vmem:[%s3528_s6 + $0x40] sm:$0xff]  ;;  %v2591_v48 = vld [vmem:[%s3528_s6 + $0xf8] sm:$0xff] }
 0x292   :  { %v1564_v2 = vadd.f32 %v1563_v57, %v1531_v58  ;;  %v1641_v33 = vadd.f32 %v3371_v26, %v1629_v14  ;;  %v1647_v58 = vmax.f32 %v1639_v62, 0.0  ;;  %v2588_v31 = vld [vmem:[%s3528_s6 + $0xe0] sm:$0xff] }
 0x293   :  { %v1590_v11 = vld [vmem:[#allocation4 + $0x31] sm:$0xff]  ;;  %v1628_v22 = vmax.f32 %v1596_v3, %v1620_v60 }
 0x294   :  { %v1606_v61 = vld [vmem:[#allocation4 + $0x36] sm:$0xff]  ;;  %1575 = vst [vmem:[#allocation4 + $0x40] sm:$0xff] %v1564_v2  ;;  %v1598_v18 = vmax.f32 %v1559_v12, %v1590_v11  ;;  %v1594_v12 = vmax.f32 %v3356_v42, %v1586_v40  ;;  %v2583_v42 = vld [vmem:[%s3528_s6 + $0xb8] sm:$0xff]  ;;  %v2580_v11 = vld [vmem:[%s3528_s6 + $0xa0] sm:$0xff] }
 0x295   :  { %v1614_v32 = vld [vmem:[#allocation4 + $0x37] sm:$0xff]  ;;  %v1640_v4 = vadd.f32 %v3371_v26, %v1628_v22  ;;  %1918 = vmatpush.bf16.msrb.mxu1 %v2583_v42  ;;  %v2575_v2 = vld [vmem:[%s3528_s6 + $0x78] sm:$0xff]  ;;  %v2560_v40 = vld [vmem:[%s3528_s6] sm:$0xff] }
 0x296   :  { %v1622_v1 = vmax.f32 %v1606_v61, %v1614_v32  ;;  %v1626_v41 = vmax.f32 %v1594_v12, %v1618_v0  ;;  %v2558_v61 = vld [vmem:[%s3523_s1] sm:$0xff]  ;;  %v2574_v32 = vld [vmem:[%s3528_s6 + $0x70] sm:$0xff]  ;;  %v2561_v60 = vld [vmem:[%s3528_s6 + $0x8] sm:$0xff] }
 0x297   :  { %v1532_v16 = vpop.f32.mrf.mxu3  ;;  %v1648_v7 = vmax.f32 %v1640_v4, 0.0  ;;  %v2586_v3 = vld [vmem:[%s3528_s6 + $0xd0] sm:$0xff]  ;;  %v2595_v12 = vld [vmem:[%s3530_s8 + $0x18] sm:$0xff] }
 0x298   :  { %v1630_v20 = vmax.f32 %v1598_v18, %v1622_v1  ;;  %v1638_v9 = vadd.f32 %v3371_v26, %v1626_v41  ;;  %v2559_v18 = vld [vmem:[%s3523_s1 + $0x8] sm:$0xff]  ;;  %v2570_v1 = vld [vmem:[%s3528_s6 + $0x50] sm:$0xff] }
 0x299   :  { %v1565_v37 = vpop.f32.mrf.mxu2  ;;  %1919 = vmatpush.bf16.msrb.mxu1 %v2582_v39  ;;  %v2589_v16 = vld [vmem:[%s3528_s6 + $0xe8] sm:$0xff]  ;;  %v2594_v0 = vld [vmem:[%s3530_s8 + $0x10] sm:$0xff] }
 0x29a   :  { %v1642_v38 = vadd.f32 %v3371_v26, %v1630_v20  ;;  %v1646_v55 = vmax.f32 %v1638_v9, 0.0  ;;  %v2587_v37 = vld [vmem:[%s3528_s6 + $0xd8] sm:$0xff]  ;;  %v2584_v20 = vld [vmem:[%s3528_s6 + $0xc0] sm:$0xff] }
 0x29b   :  { %v1591_v8 = vld [vmem:[#allocation4 + $0x39] sm:$0xff] }
 0x29c   :  { %v1607_v30 = vld [vmem:[#allocation4 + $0x3e] sm:$0xff]  ;;  %v1599_v25 = vmax.f32 %v1561_v36, %v1591_v8  ;;  %v1650_v34 = vmax.f32 %v1642_v38, 0.0  ;;  %v1649_v36 = vmax.f32 %v1641_v33, 0.0  ;;  %v1653_v57 = vpack.c.bf16 %v1647_v58, %v1646_v55  ;;  %v2596_v38 = vld [vmem:[%s3530_s8 + $0x20] sm:$0xff]  ;;  %v2593_v33 = vld [vmem:[%s3530_s8 + $0x8] sm:$0xff] }
 0x29d   :  { %v1615_v17 = vld [vmem:[#allocation4 + $0x3f] sm:$0xff]  ;;  %1920 = vmatpush.bf16.msrb.mxu1 %v2581_v45  ;;  %v2608_v58 = vld [vmem:[%s3531_s9] ss:$0 sm:$0xff] }
 0x29e   :  { %v1623_v52 = vmax.f32 %v1607_v30, %v1615_v17  ;;  %v1654_v43 = vpack.c.bf16 %v1649_v36, %v1648_v7  ;;  %v2598_v8 = vld [vmem:[%s3530_s8 + $0x30] sm:$0xff] }
 0x2a0   :  { %v1631_v50 = vmax.f32 %v1599_v25, %v1623_v52 }
 0x2a1   :  { %1921 = vmatpush.bf16.msrb.mxu1 %v2580_v11 }
 0x2a2   :  { %v1643_v13 = vadd.f32 %v3371_v26, %v1631_v50  ;;  %v2565_v26 = vld [vmem:[%s3528_s6 + $0x28] sm:$0xff] }
 0x2a3   :  { %1843 = vmatpush.bf16.msrb.mxu0 %v2565_v26  ;;  %v2597_v50 = vld [vmem:[%s3530_s8 + $0x28] sm:$0xff] }
 0x2a4   :  { %v1651_v5 = vmax.f32 %v1643_v13, 0.0 }
 0x2a5   :  { %1922 = vmatpush.bf16.msrb.mxu1 %v2579_v28 }
 0x2a6   :  { %v1655_v44 = vpack.c.bf16 %v1651_v5, %v1650_v34 }
 0x2a7   :  { %1844 = vmatpush.bf16.msrb.mxu0 %v2564_v15 }
 0x2a8   :  { %1681 = vmatpush.bf16.msrb.mxu3 %v1655_v44 }
 0x2a9   :  { %1923 = vmatpush.bf16.msrb.mxu1 %v2578_v19 }
 0x2ab   :  { %1845 = vmatpush.bf16.msrb.mxu0 %v2563_v29 }
 0x2ac   :  { %1682 = vmatpush.bf16.msrb.mxu3 %v1654_v43 }
 0x2ad   :  { %1924 = vmatpush.bf16.msrb.mxu1 %v2577_v54 }
 0x2af   :  { %1846 = vmatpush.bf16.msrb.mxu0 %v2562_v59 }
 0x2b0   :  { %1683 = vmatpush.bf16.msrb.mxu3 %v1653_v57 }
 0x2b1   :  { %1925 = vmatpush.bf16.msrb.mxu1 %v2576_v53 }
 0x2b3   :  { %1847 = vmatpush.bf16.msrb.mxu0 %v2561_v60 }
 0x2b4   :  { %1684 = vmatpush.bf16.msrb.mxu3 %v1652_v56  ;;  %v2590_v56 = vld [vmem:[%s3528_s6 + $0xf0] sm:$0xff] }
 0x2b7   :  { %2347 = vmatmul.msk.bf16.vlgmr.msrb.gmra.mxu3 %vm1670_vm2, %v2558_v61  ;;  %1848 = vmatpush.bf16.msrb.mxu0 %v2560_v40 }
 0x2b8   :  { %1780 = vmatpush.bf16.msra.mxu3 %v2575_v2 }
 0x2bb   :  { %2085 = vmatpush.bf16.msra.mxu0 %v2599_v10 }
 0x2bc   :  { %1781 = vmatpush.bf16.msra.mxu3 %v2574_v32 }
 0x2bf   :  { %2086 = vmatpush.bf16.msra.mxu0 %v2598_v8 }
 0x2c0   :  { %1782 = vmatpush.bf16.msra.mxu3 %v2573_v24 }
 0x2c3   :  { %2087 = vmatpush.bf16.msra.mxu0 %v2597_v50 }
 0x2c4   :  { %1783 = vmatpush.bf16.msra.mxu3 %v2572_v63 }
 0x2c7   :  { %2348 = vmatmul.msk.bf16.gmra.mxu3 %vm1670_vm2, %v2559_v18  ;;  %2088 = vmatpush.bf16.msra.mxu0 %v2596_v38 }
 0x2c8   :  { %1784 = vmatpush.bf16.msra.mxu3 %v2571_v49 }
 0x2cb   :  { %2089 = vmatpush.bf16.msra.mxu0 %v2595_v12 }
 0x2cc   :  { %1785 = vmatpush.bf16.msra.mxu3 %v2570_v1 }
 0x2cf   :  { %2090 = vmatpush.bf16.msra.mxu0 %v2594_v0 }
 0x2d0   :  { %1786 = vmatpush.bf16.msra.mxu3 %v2569_v6 }
 0x2d3   :  { %2091 = vmatpush.bf16.msra.mxu0 %v2593_v33 }
 0x2d4   :  { %1787 = vmatpush.bf16.msra.mxu3 %v2568_v23 }
 0x2d7   :  { %2092 = vmatpush.bf16.msra.mxu0 %v2592_v27 }
 0x2d8   :  { %1996 = vmatpush.bf16.msrb.mxu3 %v2591_v48 }
 0x2dc   :  { %1997 = vmatpush.bf16.msrb.mxu3 %v2590_v56 }
 0x2e0   :  { %1998 = vmatpush.bf16.msrb.mxu3 %v2589_v16 }
 0x2e4   :  { %1999 = vmatpush.bf16.msrb.mxu3 %v2588_v31 }
 0x2e8   :  { %2000 = vmatpush.bf16.msrb.mxu3 %v2587_v37 }
 0x2ec   :  { %2001 = vmatpush.bf16.msrb.mxu3 %v2586_v3 }
 0x2f0   :  { %2002 = vmatpush.bf16.msrb.mxu3 %v2585_v47 }
 0x2f4   :  { %2003 = vmatpush.bf16.msrb.mxu3 %v2584_v20 }
 0x33a   :  { %v1686_v30 = vpop.f32.mrf.mxu3 }
 0x33b   :  { %v1696_v17 = vpack.c.bf16 %v1686_v30, %v1686_v30 }
 0x33d   :  { %1849 = vmatmul.bf16.vlgmr.msrb.gmra.mxu0 %v1696_v17 }
 0x342   :  { %v1688_v21 = vpop.f32.mrf.mxu3 }
 0x343   :  { %v1697_v25 = vpack.c.bf16 %v1688_v21, %v1688_v21 }
 0x345   :  { %1788 = vmatmul.bf16.vlgmr.msra.gmra.mxu3 %v1697_v25 }
 0x34a   :  { %v1691_v52 = vpop.f32.mrf.mxu3 }
 0x34b   :  { %v1698_v14 = vpack.c.bf16 %v1691_v52, %v1691_v52 }
 0x34d   :  { %1926 = vmatmul.bf16.vlgmr.msrb.gmra.mxu1 %v1698_v14 }
 0x352   :  { %v1693_v35 = vpop.f32.mrf.mxu3 }
 0x353   :  { %v1699_v22 = vpack.c.bf16 %v1693_v35, %v1693_v35 }
 0x355   :  { %2004 = vmatmul.bf16.vlgmr.msrb.gmra.mxu3 %v1699_v22 }
 0x3ba   :  { %v1850_v13 = vpop.f32.mrf.mxu0 }
 0x3c2   :  { %v1852_v34 = vpop.f32.mrf.mxu0 }
 0x3c8   :  { %v1789_v5 = vpop.f32.mrf.mxu3 }
 0x3c9   :  { %v1851_v36 = vadd.f32 %v1850_v13, %v1789_v5 }
 0x3ca   :  { %v1927_v4 = vpop.f32.mrf.mxu1 }
 0x3cb   :  { %v1931_v62 = vadd.f32 %v1927_v4, %v1851_v36 }
 0x3d0   :  { %v1791_v41 = vpop.f32.mrf.mxu3 }
 0x3d2   :  { %v1929_v44 = vpop.f32.mrf.mxu1 }
 0x3d8   :  { %v2005_v42 = vpop.f32.mrf.mxu3 }
 0x3d9   :  { %v2009_v7 = vadd.f32 %v2005_v42, %v1931_v62 }
 0x3db   :  { %v2014_v9 = vadd.f32 %v2607_v46, %v2009_v7 }
 0x3dd   :  { %v2015_v51 = vmax.f32 %v2014_v9, 0.0 }
 0x3df   :  { %v2016_v39 = vpack.c.bf16 %v2015_v51, %v2015_v51 }
 0x3e0   :  { %v2007_v43 = vpop.f32.mrf.mxu3 }
 0x3e1   :  { %2093 = vmatmul.bf16.vlgmr.msra.gmra.mxu0 %v2016_v39 }
 0x45e   :  { %v2094_v55 = vpop.f32.mrf.mxu0 }
 0x45f   :  { %v2095_v26 = vadd.f32 %v2608_v58, %v2094_v55 }
 0x461   :  { %2098 = vst [vmem:[#allocation5] sm:$0x3] %v2095_v26 }
 0x462   :  { %2109 = dma.vmem_to_hbm [thread:$0]  %s2105_s14, 32, %s2107_s17, [#allocation6]  }
 0x466   :  { %v2096_v45 = vpop.f32.mrf.mxu0 }
 0x467   :  { %2633 = dma.done.wait [#allocation6], 32  }
 0x468   :  { %2634 = vsyncadd [#allocation6], 4294967264 }
 0x469   :  { %2114 = vsyncpa [#allocation6], 1 }

</bundles_post_ra>
